<compile_context>
chip_gen: v7x
topology: tpu7x:2x2x1
jax: 0.10.0
libtpu: 0.0.40
codegen_flags: <defaults>
</compile_context>

<pallas_src>
import functools

import jax
import jax.numpy as jnp
from jax import lax
from jax.experimental import pallas as pl
from jax.experimental.pallas import tpu as pltpu


def _leaky_relu(x, slope=0.2):
    return jnp.where(x > 0, x, slope * x)


# ---------------------------------------------------------------------------
# Kernel A (fused): pairwise negative squared distances (knn score matrix) +
# edge-conv projection for the same column tile.
# grid=(B, N//TN): each step computes
#   d[b, r_block, :]  = -||xi - xj||^2 for TN query rows       (f32, kNN ranking)
#   a[b, :, r_block]  = scale * (W1 @ x)        (gathered per neighbor outside)
#   bb[b, :, r_block] = scale * ((W2-W1) @ x) + shift          (per-center term)
# ---------------------------------------------------------------------------
def dist_proj_kernel(xq_ref, xa_ref, wcat_ref, scale_ref, shift_ref,
                     d_ref, a_ref, b_ref, *, cout):
    xq = xq_ref[0]                                                    # (C, TN) query cols
    xa = xa_ref[0]                                                    # (C, N)  all points
    # --- pairwise distance rows (f32 for ranking accuracy) ---
    gram = lax.dot_general(xq, xa, (((0,), (0,)), ((), ())),
                           preferred_element_type=jnp.float32)        # (TN, N) = xq^T xa
    sq_q = jnp.sum(xq * xq, axis=0, keepdims=True)                    # (1, TN)
    sq_a = jnp.sum(xa * xa, axis=0, keepdims=True)                    # (1, N)
    d_ref[0] = 2.0 * gram - jnp.transpose(sq_q) - sq_a                # -||xi - xj||^2
    # --- edge-conv projection for the same TN columns (bf16 MXU, f32 acc) ---
    h = jnp.dot(wcat_ref[...], xq.astype(jnp.bfloat16),
                preferred_element_type=jnp.float32)                   # (2*Cout, TN)
    scale = scale_ref[...]                                            # (Cout, 1)
    shift = shift_ref[...]                                            # (Cout, 1)
    a_ref[0] = h[:cout] * scale                                       # term to gather
    b_ref[0] = h[cout:] * scale + shift                               # per-center term


def dist_and_proj(x, wcat, scale, shift, row_tile=256):
    B, C, N = x.shape
    cout = scale.shape[0]
    tn = row_tile if (N > row_tile and N % row_tile == 0) else N
    kern = functools.partial(dist_proj_kernel, cout=cout)
    return pl.pallas_call(
        kern,
        out_shape=(jax.ShapeDtypeStruct((B, N, N), jnp.float32),
                   jax.ShapeDtypeStruct((B, cout, N), jnp.float32),
                   jax.ShapeDtypeStruct((B, cout, N), jnp.float32)),
        grid=(B, N // tn),
        in_specs=[
            pl.BlockSpec((1, C, tn), lambda b, r: (b, 0, r)),
            pl.BlockSpec((1, C, N), lambda b, r: (b, 0, 0)),
            pl.BlockSpec((2 * cout, C), lambda b, r: (0, 0)),
            pl.BlockSpec((cout, 1), lambda b, r: (0, 0)),
            pl.BlockSpec((cout, 1), lambda b, r: (0, 0)),
        ],
        out_specs=(pl.BlockSpec((1, tn, N), lambda b, r: (b, r, 0)),
                   pl.BlockSpec((1, cout, tn), lambda b, r: (b, 0, r)),
                   pl.BlockSpec((1, cout, tn), lambda b, r: (b, 0, r))),
        compiler_params=pltpu.CompilerParams(
            dimension_semantics=("parallel", "parallel")),
    )(x, x, wcat, scale, shift)


# ---------------------------------------------------------------------------
# Kernel B: per-neighbor combine + LeakyReLU + running max over k.
# grid=(B, k); the output block is VMEM-resident across the k axis (accumulator);
# the per-center term bb has a constant block index over k so it is fetched once.
# ---------------------------------------------------------------------------
def edge_combine_kernel(g_ref, b_ref, o_ref):
    j = pl.program_id(1)
    h = _leaky_relu(g_ref[0, 0] + b_ref[0])                            # (Cout, N)

    @pl.when(j == 0)
    def _():
        o_ref[0] = h

    @pl.when(j > 0)
    def _():
        o_ref[0] = jnp.maximum(o_ref[0], h)


def edge_combine(g, bb):
    B, k, cout, N = g.shape
    return pl.pallas_call(
        edge_combine_kernel,
        out_shape=jax.ShapeDtypeStruct((B, cout, N), jnp.float32),
        grid=(B, k),
        in_specs=[
            pl.BlockSpec((1, 1, cout, N), lambda b, j: (b, j, 0, 0)),
            pl.BlockSpec((1, cout, N), lambda b, j: (b, 0, 0)),
        ],
        out_specs=pl.BlockSpec((1, cout, N), lambda b, j: (b, 0, 0)),
        compiler_params=pltpu.CompilerParams(
            dimension_semantics=("parallel", "arbitrary")),
    )(g, bb)


# ---------------------------------------------------------------------------
# Kernel C: conv5 (1x1 Conv1d) + BN1d + LeakyReLU + max/avg pool over points.
# Computed transposed ((N, emb)) so both pooled vectors come out lane-dense:
#   output (B, 1, 2*emb) laid out as [max..., avg...] — no XLA transpose needed.
# ---------------------------------------------------------------------------
def conv5_pool_kernel(f_ref, wt_ref, scale_ref, shift_ref, o_ref):
    f = f_ref[0].astype(jnp.bfloat16)                                  # (Csum, N)
    h = lax.dot_general(f, wt_ref[...], (((0,), (0,)), ((), ())),
                        preferred_element_type=jnp.float32)            # (N, emb)
    h = h * scale_ref[...] + shift_ref[...]                            # eval-mode BatchNorm1d
    h = _leaky_relu(h)
    mx = jnp.max(h, axis=0, keepdims=True)                             # (1, emb)
    av = jnp.mean(h, axis=0, keepdims=True)                            # (1, emb)
    o_ref[0] = jnp.concatenate([mx, av], axis=1)                       # (1, 2*emb)


def conv5_pool(feat, wt, scale, shift):
    B, csum, N = feat.shape
    emb = wt.shape[1]
    return pl.pallas_call(
        conv5_pool_kernel,
        out_shape=jax.ShapeDtypeStruct((B, 1, 2 * emb), jnp.float32),
        grid=(B,),
        in_specs=[
            pl.BlockSpec((1, csum, N), lambda b: (b, 0, 0)),
            pl.BlockSpec((csum, emb), lambda b: (0, 0)),
            pl.BlockSpec((1, emb), lambda b: (0, 0)),
            pl.BlockSpec((1, emb), lambda b: (0, 0)),
        ],
        out_specs=pl.BlockSpec((1, 1, 2 * emb), lambda b: (b, 0, 0)),
        compiler_params=pltpu.CompilerParams(dimension_semantics=("parallel",)),
    )(feat, wt, scale, shift)


# ---------------------------------------------------------------------------
# Kernel D: MLP head  (linear1/BN6 -> LeakyReLU -> linear2/BN7 -> LeakyReLU -> linear3)
# Whole batch processed at once; bf16 MXU inputs, f32 accumulation / BN / activations.
# ---------------------------------------------------------------------------
def head_kernel(x_ref, w1t_ref, s6_ref, b6_ref, w2t_ref, bias2_ref, s7_ref, b7_ref,
                w3t_ref, bias3_ref, o_ref):
    x = x_ref[...].astype(jnp.bfloat16)                                 # (B, 2*emb)
    h = jnp.dot(x, w1t_ref[...], preferred_element_type=jnp.float32)    # (B, 512), bias=False
    h = h * s6_ref[...] + b6_ref[...]                                   # eval-mode BatchNorm1d
    h = _leaky_relu(h)
    # TODO(synk): Dropout(p=0.5) is identity in eval mode; training-mode dropout not implemented.
    h = jnp.dot(h.astype(jnp.bfloat16), w2t_ref[...],
                preferred_element_type=jnp.float32) + bias2_ref[...]
    h = h * s7_ref[...] + b7_ref[...]
    h = _leaky_relu(h)
    o_ref[...] = jnp.dot(h.astype(jnp.bfloat16), w3t_ref[...],
                         preferred_element_type=jnp.float32) + bias3_ref[...]


def head(x, hp):
    B = x.shape[0]
    args = (x, hp["w1t"], hp["s6"], hp["b6"], hp["w2t"], hp["bias2"],
            hp["s7"], hp["b7"], hp["w3t"], hp["bias3"])
    return pl.pallas_call(
        head_kernel,
        out_shape=jax.ShapeDtypeStruct((B, 3), jnp.float32),
        grid=(1,),
        in_specs=[pl.BlockSpec(a.shape, lambda i, nd=a.ndim: (0,) * nd) for a in args],
        out_specs=pl.BlockSpec((B, 3), lambda i: (0, 0)),
    )(*args)


# ---------------------------------------------------------------------------
# Full forward pass (glue: top-k, index gather, concatenation)
# ---------------------------------------------------------------------------
def dgcnn_forward(x, params, mlp_list, k):
    B, _, N = x.shape
    features = []
    cur = x
    for i in range(len(mlp_list) - 1):
        p = params[f"conv{i}"]
        # Fused: kNN score matrix + folded-BN edge-conv projection, one HBM pass over cur.
        d, a, bb = dist_and_proj(cur, p["wcat"], p["scale"], p["shift"])
        # TODO(synk): top-k selection stays in XLA (lax.top_k); a fused Pallas
        # distance+top-k kernel would avoid materializing (B, N, N) in HBM.
        idx = lax.top_k(d, k)[1]                     # (B, N, k) k nearest neighbors
        # TODO(synk): neighbor gather uses XLA take_along_axis; an in-kernel gather via
        # scalar-prefetched SMEM indices has no robust Mosaic lane-gather lowering.
        idx_t = jnp.transpose(idx, (0, 2, 1))        # (B, k, N)
        g = jnp.take_along_axis(a[:, None, :, :], idx_t[:, :, None, :], axis=3)  # (B,k,Cout,N)
        cur = edge_combine(g, bb)                    # (B, Cout, N)
        features.append(cur)
    feat = jnp.concatenate(features, axis=1)         # (B, sum(mlp_list[1:]), N)
    p5 = params["conv5"]
    pooled = conv5_pool(feat, p5["wt"], p5["scale"], p5["shift"])       # (B, 1, 2*emb)
    xp = pooled.reshape(B, -1)                       # [max..., avg...]  (no transpose)
    return head(xp, params["head"])


# ---------------------------------------------------------------------------
# Deterministic parameter construction (eval-mode BatchNorms folded to scale/shift;
# matmul weights stored in bf16 for the MXU, BN params in f32).
# ---------------------------------------------------------------------------
def make_params(key, mlp_list):
    eps = 1e-5
    emb = mlp_list[-1]
    params = {}
    keys = iter(jax.random.split(key, 64))

    def nrm(shape, scale):
        return (scale * jax.random.normal(next(keys), shape)).astype(jnp.float32)

    def bn_fold(c):
        gamma = 1.0 + 0.1 * jax.random.normal(next(keys), (c,))
        beta = 0.1 * jax.random.normal(next(keys), (c,))
        mean = 0.05 * jax.random.normal(next(keys), (c,))
        var = 1.0 + 0.2 * jax.random.uniform(next(keys), (c,))
        scale = (gamma / jnp.sqrt(var + eps)).astype(jnp.float32)
        shift = (beta - mean * scale).astype(jnp.float32)
        return scale, shift

    for i in range(len(mlp_list) - 1):
        cin, cout = mlp_list[i], mlp_list[i + 1]
        w = nrm((cout, 2 * cin), 1.0 / float(2 * cin) ** 0.5)          # Conv2d(2cin, cout, 1)
        w1, w2 = w[:, :cin], w[:, cin:]                                # on (nbr - x), on x
        wcat = jnp.concatenate([w1, w2 - w1], axis=0).astype(jnp.bfloat16)   # (2cout, cin)
        scale, shift = bn_fold(cout)
        params[f"conv{i}"] = dict(wcat=wcat,
                                  scale=scale.reshape(cout, 1),
                                  shift=shift.reshape(cout, 1))

    csum = sum(mlp_list[1:])
    w5 = nrm((emb, csum), 1.0 / float(csum) ** 0.5)                    # Conv1d(csum, emb, 1)
    s5, sh5 = bn_fold(emb)
    params["conv5"] = dict(wt=jnp.transpose(w5).astype(jnp.bfloat16),  # (csum, emb)
                           scale=s5.reshape(1, emb), shift=sh5.reshape(1, emb))

    w1 = nrm((512, 2 * emb), 1.0 / float(2 * emb) ** 0.5)              # Linear(2*emb, 512, bias=False)
    s6, b6 = bn_fold(512)
    w2 = nrm((256, 512), 1.0 / 512.0 ** 0.5)                           # Linear(512, 256)
    bias2 = nrm((256,), 0.02)
    s7, b7 = bn_fold(256)
    w3 = nrm((3, 256), 1.0 / 256.0 ** 0.5)                             # Linear(256, 3)
    bias3 = nrm((3,), 0.02)
    params["head"] = dict(
        w1t=jnp.transpose(w1).astype(jnp.bfloat16),
        s6=s6.reshape(1, 512), b6=b6.reshape(1, 512),
        w2t=jnp.transpose(w2).astype(jnp.bfloat16), bias2=bias2.reshape(1, 256),
        s7=s7.reshape(1, 256), b7=b7.reshape(1, 256),
        w3t=jnp.transpose(w3).astype(jnp.bfloat16), bias3=bias3.reshape(1, 3))
    return params


if __name__ == "__main__":
    mlp_list = [3, 16, 32]   # conv layers: Conv2d(6,16), Conv2d(32,32); conv5: Conv1d(48,32)
    k = 4
    B, N = 2, 16

    key = jax.random.PRNGKey(0)
    kx, kp = jax.random.split(key)
    x = jax.random.normal(kx, (B, mlp_list[0], N), dtype=jnp.float32)  # (B, C0, N) point cloud

    params = make_params(kp, mlp_list)
    fwd = jax.jit(functools.partial(dgcnn_forward, mlp_list=tuple(mlp_list), k=k))
    out = fwd(x, params)
    out = jax.block_until_ready(out)
    assert out.shape == (B, 3) and out.dtype == jnp.float32
    print("KERNEL_OK")
</pallas_src>

<mosaic_0001>
module attributes {stable_mosaic.version = 11 : i64} {
  func.func @dist_proj_kernel(%arg0: i32, %arg1: i32, %arg2: memref<1x3x16xf32, #tpu.memory_space<vmem>>, %arg3: memref<1x3x16xf32, #tpu.memory_space<vmem>>, %arg4: memref<32x3xbf16, #tpu.memory_space<vmem>>, %arg5: memref<16x1xf32, #tpu.memory_space<vmem>>, %arg6: memref<16x1xf32, #tpu.memory_space<vmem>>, %arg7: memref<1x16x16xf32, #tpu.memory_space<vmem>>, %arg8: memref<1x16x16xf32, #tpu.memory_space<vmem>>, %arg9: memref<1x16x16xf32, #tpu.memory_space<vmem>>) attributes {dimension_semantics = [#tpu.dimension_semantics<parallel>, #tpu.dimension_semantics<parallel>], iteration_bounds = array<i64: 2, 1>, scalar_prefetch = 0 : i64, scratch_operands = 0 : i64, tpu.core_type = #tpu.core_type<tc>, window_params = [{transform_indices = @transform_0, window_bounds = array<i64: 1, 3, 16>}, {transform_indices = @transform_1, window_bounds = array<i64: 1, 3, 16>}, {pipeline_mode = #tpu.pipeline_mode<synchronous>, transform_indices = @transform_2, window_bounds = array<i64: 32, 3>}, {pipeline_mode = #tpu.pipeline_mode<synchronous>, transform_indices = @transform_3, window_bounds = array<i64: 16, 1>}, {pipeline_mode = #tpu.pipeline_mode<synchronous>, transform_indices = @transform_4, window_bounds = array<i64: 16, 1>}, {transform_indices = @transform_5, window_bounds = array<i64: 1, 16, 16>}, {transform_indices = @transform_6, window_bounds = array<i64: 1, 16, 16>}, {transform_indices = @transform_7, window_bounds = array<i64: 1, 16, 16>}]} {
    %c0 = arith.constant 0 : index
    %c0_0 = arith.constant 0 : index
    %c0_1 = arith.constant 0 : index
    %0 = vector.load %arg2[%c0, %c0_0, %c0_1] : memref<1x3x16xf32, #tpu.memory_space<vmem>>, vector<1x3x16xf32>
    %1 = vector.shape_cast %0 : vector<1x3x16xf32> to vector<3x16xf32>
    %c0_2 = arith.constant 0 : index
    %c0_3 = arith.constant 0 : index
    %c0_4 = arith.constant 0 : index
    %2 = vector.load %arg3[%c0_2, %c0_3, %c0_4] : memref<1x3x16xf32, #tpu.memory_space<vmem>>, vector<1x3x16xf32>
    %3 = vector.shape_cast %2 : vector<1x3x16xf32> to vector<3x16xf32>
    %cst = arith.constant dense<0.000000e+00> : vector<16x16xf32>
    %4 = tpu.matmul %1, %3, %cst {dimension_numbers = #tpu.dot_dimension_numbers<[0], [0], [1], [1], [0, 1, 1, 1], [], []>} : vector<3x16xf32>, vector<3x16xf32>, vector<16x16xf32> -> vector<16x16xf32>
    %5 = arith.mulf %1, %1 : vector<3x16xf32>
    %cst_5 = arith.constant dense<0.000000e+00> : vector<16xf32>
    %6 = vector.multi_reduction <add>, %5, %cst_5 [0] : vector<3x16xf32> to vector<16xf32>
    %7 = vector.shape_cast %6 : vector<16xf32> to vector<1x16xf32>
    %8 = arith.mulf %3, %3 : vector<3x16xf32>
    %cst_6 = arith.constant dense<0.000000e+00> : vector<16xf32>
    %9 = vector.multi_reduction <add>, %8, %cst_6 [0] : vector<3x16xf32> to vector<16xf32>
    %10 = vector.shape_cast %9 : vector<16xf32> to vector<1x16xf32>
    %cst_7 = arith.constant 2.000000e+00 : f32
    %11 = vector.broadcast %cst_7 : f32 to vector<16x16xf32>
    %12 = arith.mulf %11, %4 : vector<16x16xf32>
    %13 = tpu.transpose %7, [1, 0] : vector<1x16xf32> -> vector<16x1xf32>
    %14 = vector.broadcast %13 : vector<16x1xf32> to vector<16x16xf32>
    %15 = arith.subf %12, %14 : vector<16x16xf32>
    %16 = vector.broadcast %10 : vector<1x16xf32> to vector<16x16xf32>
    %17 = arith.subf %15, %16 : vector<16x16xf32>
    %c0_8 = arith.constant 0 : index
    %c0_9 = arith.constant 0 : index
    %c0_10 = arith.constant 0 : index
    %18 = vector.load %arg7[%c0_8, %c0_9, %c0_10] : memref<1x16x16xf32, #tpu.memory_space<vmem>>, vector<1x16x16xf32>
    %19 = vector.shape_cast %18 : vector<1x16x16xf32> to vector<16x16xf32>
    %20 = vector.shape_cast %17 : vector<16x16xf32> to vector<1x16x16xf32>
    tpu.vector_store %arg7[%c0_8, %c0_9, %c0_10], %20 {strides = array<i32>} : memref<1x16x16xf32, #tpu.memory_space<vmem>>, vector<1x16x16xf32>,
    %c0_11 = arith.constant 0 : index
    %c0_12 = arith.constant 0 : index
    %21 = vector.load %arg4[%c0_11, %c0_12] : memref<32x3xbf16, #tpu.memory_space<vmem>>, vector<32x3xbf16>
    %22 = arith.truncf %1 : vector<3x16xf32> to vector<3x16xbf16>
    %cst_13 = arith.constant dense<0.000000e+00> : vector<32x16xf32>
    %23 = tpu.matmul %21, %22, %cst_13 {dimension_numbers = #tpu.dot_dimension_numbers<[1], [0], [0], [1], [0, 0, 1, 1], [], []>} : vector<32x3xbf16>, vector<3x16xbf16>, vector<32x16xf32> -> vector<32x16xf32>
    %c0_14 = arith.constant 0 : index
    %c0_15 = arith.constant 0 : index
    %24 = vector.load %arg5[%c0_14, %c0_15] : memref<16x1xf32, #tpu.memory_space<vmem>>, vector<16x1xf32>
    %c0_16 = arith.constant 0 : index
    %c0_17 = arith.constant 0 : index
    %25 = vector.load %arg6[%c0_16, %c0_17] : memref<16x1xf32, #tpu.memory_space<vmem>>, vector<16x1xf32>
    %26 = vector.extract_strided_slice %23 {offsets = [0, 0], sizes = [16, 16], strides = [1, 1]} : vector<32x16xf32> to vector<16x16xf32>
    %27 = vector.broadcast %24 : vector<16x1xf32> to vector<16x16xf32>
    %28 = arith.mulf %26, %27 : vector<16x16xf32>
    %c0_18 = arith.constant 0 : index
    %c0_19 = arith.constant 0 : index
    %c0_20 = arith.constant 0 : index
    %29 = vector.load %arg8[%c0_18, %c0_19, %c0_20] : memref<1x16x16xf32, #tpu.memory_space<vmem>>, vector<1x16x16xf32>
    %30 = vector.shape_cast %29 : vector<1x16x16xf32> to vector<16x16xf32>
    %31 = vector.shape_cast %28 : vector<16x16xf32> to vector<1x16x16xf32>
    tpu.vector_store %arg8[%c0_18, %c0_19, %c0_20], %31 {strides = array<i32>} : memref<1x16x16xf32, #tpu.memory_space<vmem>>, vector<1x16x16xf32>,
    %32 = vector.extract_strided_slice %23 {offsets = [16, 0], sizes = [16, 16], strides = [1, 1]} : vector<32x16xf32> to vector<16x16xf32>
    %33 = vector.broadcast %24 : vector<16x1xf32> to vector<16x16xf32>
    %34 = arith.mulf %32, %33 : vector<16x16xf32>
    %35 = vector.broadcast %25 : vector<16x1xf32> to vector<16x16xf32>
    %36 = arith.addf %34, %35 : vector<16x16xf32>
    %c0_21 = arith.constant 0 : index
    %c0_22 = arith.constant 0 : index
    %c0_23 = arith.constant 0 : index
    %37 = vector.load %arg9[%c0_21, %c0_22, %c0_23] : memref<1x16x16xf32, #tpu.memory_space<vmem>>, vector<1x16x16xf32>
    %38 = vector.shape_cast %37 : vector<1x16x16xf32> to vector<16x16xf32>
    %39 = vector.shape_cast %36 : vector<16x16xf32> to vector<1x16x16xf32>
    tpu.vector_store %arg9[%c0_21, %c0_22, %c0_23], %39 {strides = array<i32>} : memref<1x16x16xf32, #tpu.memory_space<vmem>>, vector<1x16x16xf32>,
    return
  }
  func.func @transform_0(%arg0: i32, %arg1: i32) -> (i32, i32, i32) {
    %c0_i32 = arith.constant 0 : i32
    %c0_i32_0 = arith.constant 0 : i32
    return %arg0, %c0_i32, %arg1 : i32, i32, i32
  }
  func.func @transform_1(%arg0: i32, %arg1: i32) -> (i32, i32, i32) {
    %c0_i32 = arith.constant 0 : i32
    %c0_i32_0 = arith.constant 0 : i32
    %c0_i32_1 = arith.constant 0 : i32
    return %arg0, %c0_i32, %c0_i32_0 : i32, i32, i32
  }
  func.func @transform_2(%arg0: i32, %arg1: i32) -> (i32, i32) {
    %c0_i32 = arith.constant 0 : i32
    %c0_i32_0 = arith.constant 0 : i32
    %c0_i32_1 = arith.constant 0 : i32
    return %c0_i32, %c0_i32_0 : i32, i32
  }
  func.func @transform_3(%arg0: i32, %arg1: i32) -> (i32, i32) {
    %c0_i32 = arith.constant 0 : i32
    %c0_i32_0 = arith.constant 0 : i32
    %c0_i32_1 = arith.constant 0 : i32
    return %c0_i32, %c0_i32_0 : i32, i32
  }
  func.func @transform_4(%arg0: i32, %arg1: i32) -> (i32, i32) {
    %c0_i32 = arith.constant 0 : i32
    %c0_i32_0 = arith.constant 0 : i32
    %c0_i32_1 = arith.constant 0 : i32
    return %c0_i32, %c0_i32_0 : i32, i32
  }
  func.func @transform_5(%arg0: i32, %arg1: i32) -> (i32, i32, i32) {
    %c0_i32 = arith.constant 0 : i32
    %c0_i32_0 = arith.constant 0 : i32
    return %arg0, %arg1, %c0_i32 : i32, i32, i32
  }
  func.func @transform_6(%arg0: i32, %arg1: i32) -> (i32, i32, i32) {
    %c0_i32 = arith.constant 0 : i32
    %c0_i32_0 = arith.constant 0 : i32
    return %arg0, %c0_i32, %arg1 : i32, i32, i32
  }
  func.func @transform_7(%arg0: i32, %arg1: i32) -> (i32, i32, i32) {
    %c0_i32 = arith.constant 0 : i32
    %c0_i32_0 = arith.constant 0 : i32
    return %arg0, %c0_i32, %arg1 : i32, i32, i32
  }
}

module attributes {stable_mosaic.version = 11 : i64} {
  func.func @edge_combine_kernel(%arg0: i32, %arg1: i32, %arg2: memref<1x1x16x16xf32, #tpu.memory_space<vmem>>, %arg3: memref<1x16x16xf32, #tpu.memory_space<vmem>>, %arg4: memref<1x16x16xf32, #tpu.memory_space<vmem>>) attributes {dimension_semantics = [#tpu.dimension_semantics<parallel>, #tpu.dimension_semantics<arbitrary>], iteration_bounds = array<i64: 2, 4>, scalar_prefetch = 0 : i64, scratch_operands = 0 : i64, tpu.core_type = #tpu.core_type<tc>, window_params = [{transform_indices = @transform_0, window_bounds = array<i64: 1, 1, 16, 16>}, {transform_indices = @transform_1, window_bounds = array<i64: 1, 16, 16>}, {transform_indices = @transform_2, window_bounds = array<i64: 1, 16, 16>}]} {
    %c0 = arith.constant 0 : index
    %c0_0 = arith.constant 0 : index
    %c0_1 = arith.constant 0 : index
    %c0_2 = arith.constant 0 : index
    %0 = vector.load %arg2[%c0, %c0_0, %c0_1, %c0_2] : memref<1x1x16x16xf32, #tpu.memory_space<vmem>>, vector<1x1x16x16xf32>
    %1 = vector.shape_cast %0 : vector<1x1x16x16xf32> to vector<16x16xf32>
    %c0_3 = arith.constant 0 : index
    %c0_4 = arith.constant 0 : index
    %c0_5 = arith.constant 0 : index
    %2 = vector.load %arg3[%c0_3, %c0_4, %c0_5] : memref<1x16x16xf32, #tpu.memory_space<vmem>>, vector<1x16x16xf32>
    %3 = vector.shape_cast %2 : vector<1x16x16xf32> to vector<16x16xf32>
    %4 = arith.addf %1, %3 : vector<16x16xf32>
    %cst = arith.constant 0.000000e+00 : f32
    %5 = vector.broadcast %cst : f32 to vector<16x16xf32>
    %6 = arith.cmpf ogt, %4, %5 : vector<16x16xf32>
    %cst_6 = arith.constant 2.000000e-01 : f32
    %7 = vector.broadcast %cst_6 : f32 to vector<16x16xf32>
    %8 = arith.mulf %7, %4 : vector<16x16xf32>
    %9 = arith.select %6, %4, %8 : vector<16x16xi1>, vector<16x16xf32>
    %c0_i32 = arith.constant 0 : i32
    %10 = arith.cmpi eq, %arg1, %c0_i32 : i32
    %11 = arith.extui %10 : i1 to i32
    %c0_i32_7 = arith.constant 0 : i32
    %12 = arith.cmpi ne, %11, %c0_i32_7 : i32
    scf.if %12 {
      %c0_10 = arith.constant 0 : index
      %c0_11 = arith.constant 0 : index
      %c0_12 = arith.constant 0 : index
      %16 = vector.load %arg4[%c0_10, %c0_11, %c0_12] : memref<1x16x16xf32, #tpu.memory_space<vmem>>, vector<1x16x16xf32>
      %17 = vector.shape_cast %16 : vector<1x16x16xf32> to vector<16x16xf32>
      %18 = vector.shape_cast %9 : vector<16x16xf32> to vector<1x16x16xf32>
      tpu.vector_store %arg4[%c0_10, %c0_11, %c0_12], %18 {strides = array<i32>} : memref<1x16x16xf32, #tpu.memory_space<vmem>>, vector<1x16x16xf32>,
    } else {
    }
    %c0_i32_8 = arith.constant 0 : i32
    %13 = arith.cmpi sgt, %arg1, %c0_i32_8 : i32
    %14 = arith.extui %13 : i1 to i32
    %c0_i32_9 = arith.constant 0 : i32
    %15 = arith.cmpi ne, %14, %c0_i32_9 : i32
    scf.if %15 {
      %c0_10 = arith.constant 0 : index
      %c0_11 = arith.constant 0 : index
      %c0_12 = arith.constant 0 : index
      %16 = vector.load %arg4[%c0_10, %c0_11, %c0_12] : memref<1x16x16xf32, #tpu.memory_space<vmem>>, vector<1x16x16xf32>
      %17 = vector.shape_cast %16 : vector<1x16x16xf32> to vector<16x16xf32>
      %18 = arith.maximumf %17, %9 : vector<16x16xf32>
      %c0_13 = arith.constant 0 : index
      %c0_14 = arith.constant 0 : index
      %c0_15 = arith.constant 0 : index
      %19 = vector.load %arg4[%c0_13, %c0_14, %c0_15] : memref<1x16x16xf32, #tpu.memory_space<vmem>>, vector<1x16x16xf32>
      %20 = vector.shape_cast %19 : vector<1x16x16xf32> to vector<16x16xf32>
      %21 = vector.shape_cast %18 : vector<16x16xf32> to vector<1x16x16xf32>
      tpu.vector_store %arg4[%c0_13, %c0_14, %c0_15], %21 {strides = array<i32>} : memref<1x16x16xf32, #tpu.memory_space<vmem>>, vector<1x16x16xf32>,
    } else {
    }
    return
  }
  func.func @transform_0(%arg0: i32, %arg1: i32) -> (i32, i32, i32, i32) {
    %c0_i32 = arith.constant 0 : i32
    %c0_i32_0 = arith.constant 0 : i32
    %c0_i32_1 = arith.constant 0 : i32
    return %arg0, %arg1, %c0_i32, %c0_i32_0 : i32, i32, i32, i32
  }
  func.func @transform_1(%arg0: i32, %arg1: i32) -> (i32, i32, i32) {
    %c0_i32 = arith.constant 0 : i32
    %c0_i32_0 = arith.constant 0 : i32
    %c0_i32_1 = arith.constant 0 : i32
    return %arg0, %c0_i32, %c0_i32_0 : i32, i32, i32
  }
  func.func @transform_2(%arg0: i32, %arg1: i32) -> (i32, i32, i32) {
    %c0_i32 = arith.constant 0 : i32
    %c0_i32_0 = arith.constant 0 : i32
    %c0_i32_1 = arith.constant 0 : i32
    return %arg0, %c0_i32, %c0_i32_0 : i32, i32, i32
  }
}

module attributes {stable_mosaic.version = 11 : i64} {
  func.func @dist_proj_kernel(%arg0: i32, %arg1: i32, %arg2: memref<1x16x16xf32, #tpu.memory_space<vmem>>, %arg3: memref<1x16x16xf32, #tpu.memory_space<vmem>>, %arg4: memref<64x16xbf16, #tpu.memory_space<vmem>>, %arg5: memref<32x1xf32, #tpu.memory_space<vmem>>, %arg6: memref<32x1xf32, #tpu.memory_space<vmem>>, %arg7: memref<1x16x16xf32, #tpu.memory_space<vmem>>, %arg8: memref<1x32x16xf32, #tpu.memory_space<vmem>>, %arg9: memref<1x32x16xf32, #tpu.memory_space<vmem>>) attributes {dimension_semantics = [#tpu.dimension_semantics<parallel>, #tpu.dimension_semantics<parallel>], iteration_bounds = array<i64: 2, 1>, scalar_prefetch = 0 : i64, scratch_operands = 0 : i64, tpu.core_type = #tpu.core_type<tc>, window_params = [{transform_indices = @transform_0, window_bounds = array<i64: 1, 16, 16>}, {transform_indices = @transform_1, window_bounds = array<i64: 1, 16, 16>}, {pipeline_mode = #tpu.pipeline_mode<synchronous>, transform_indices = @transform_2, window_bounds = array<i64: 64, 16>}, {pipeline_mode = #tpu.pipeline_mode<synchronous>, transform_indices = @transform_3, window_bounds = array<i64: 32, 1>}, {pipeline_mode = #tpu.pipeline_mode<synchronous>, transform_indices = @transform_4, window_bounds = array<i64: 32, 1>}, {transform_indices = @transform_5, window_bounds = array<i64: 1, 16, 16>}, {transform_indices = @transform_6, window_bounds = array<i64: 1, 32, 16>}, {transform_indices = @transform_7, window_bounds = array<i64: 1, 32, 16>}]} {
    %c0 = arith.constant 0 : index
    %c0_0 = arith.constant 0 : index
    %c0_1 = arith.constant 0 : index
    %0 = vector.load %arg2[%c0, %c0_0, %c0_1] : memref<1x16x16xf32, #tpu.memory_space<vmem>>, vector<1x16x16xf32>
    %1 = vector.shape_cast %0 : vector<1x16x16xf32> to vector<16x16xf32>
    %c0_2 = arith.constant 0 : index
    %c0_3 = arith.constant 0 : index
    %c0_4 = arith.constant 0 : index
    %2 = vector.load %arg3[%c0_2, %c0_3, %c0_4] : memref<1x16x16xf32, #tpu.memory_space<vmem>>, vector<1x16x16xf32>
    %3 = vector.shape_cast %2 : vector<1x16x16xf32> to vector<16x16xf32>
    %cst = arith.constant dense<0.000000e+00> : vector<16x16xf32>
    %4 = tpu.matmul %1, %3, %cst {dimension_numbers = #tpu.dot_dimension_numbers<[0], [0], [1], [1], [0, 1, 1, 1], [], []>} : vector<16x16xf32>, vector<16x16xf32>, vector<16x16xf32> -> vector<16x16xf32>
    %5 = arith.mulf %1, %1 : vector<16x16xf32>
    %cst_5 = arith.constant dense<0.000000e+00> : vector<16xf32>
    %6 = vector.multi_reduction <add>, %5, %cst_5 [0] : vector<16x16xf32> to vector<16xf32>
    %7 = vector.shape_cast %6 : vector<16xf32> to vector<1x16xf32>
    %8 = arith.mulf %3, %3 : vector<16x16xf32>
    %cst_6 = arith.constant dense<0.000000e+00> : vector<16xf32>
    %9 = vector.multi_reduction <add>, %8, %cst_6 [0] : vector<16x16xf32> to vector<16xf32>
    %10 = vector.shape_cast %9 : vector<16xf32> to vector<1x16xf32>
    %cst_7 = arith.constant 2.000000e+00 : f32
    %11 = vector.broadcast %cst_7 : f32 to vector<16x16xf32>
    %12 = arith.mulf %11, %4 : vector<16x16xf32>
    %13 = tpu.transpose %7, [1, 0] : vector<1x16xf32> -> vector<16x1xf32>
    %14 = vector.broadcast %13 : vector<16x1xf32> to vector<16x16xf32>
    %15 = arith.subf %12, %14 : vector<16x16xf32>
    %16 = vector.broadcast %10 : vector<1x16xf32> to vector<16x16xf32>
    %17 = arith.subf %15, %16 : vector<16x16xf32>
    %c0_8 = arith.constant 0 : index
    %c0_9 = arith.constant 0 : index
    %c0_10 = arith.constant 0 : index
    %18 = vector.load %arg7[%c0_8, %c0_9, %c0_10] : memref<1x16x16xf32, #tpu.memory_space<vmem>>, vector<1x16x16xf32>
    %19 = vector.shape_cast %18 : vector<1x16x16xf32> to vector<16x16xf32>
    %20 = vector.shape_cast %17 : vector<16x16xf32> to vector<1x16x16xf32>
    tpu.vector_store %arg7[%c0_8, %c0_9, %c0_10], %20 {strides = array<i32>} : memref<1x16x16xf32, #tpu.memory_space<vmem>>, vector<1x16x16xf32>,
    %c0_11 = arith.constant 0 : index
    %c0_12 = arith.constant 0 : index
    %21 = vector.load %arg4[%c0_11, %c0_12] : memref<64x16xbf16, #tpu.memory_space<vmem>>, vector<64x16xbf16>
    %22 = arith.truncf %1 : vector<16x16xf32> to vector<16x16xbf16>
    %cst_13 = arith.constant dense<0.000000e+00> : vector<64x16xf32>
    %23 = tpu.matmul %21, %22, %cst_13 {dimension_numbers = #tpu.dot_dimension_numbers<[1], [0], [0], [1], [0, 0, 1, 1], [], []>} : vector<64x16xbf16>, vector<16x16xbf16>, vector<64x16xf32> -> vector<64x16xf32>
    %c0_14 = arith.constant 0 : index
    %c0_15 = arith.constant 0 : index
    %24 = vector.load %arg5[%c0_14, %c0_15] : memref<32x1xf32, #tpu.memory_space<vmem>>, vector<32x1xf32>
    %c0_16 = arith.constant 0 : index
    %c0_17 = arith.constant 0 : index
    %25 = vector.load %arg6[%c0_16, %c0_17] : memref<32x1xf32, #tpu.memory_space<vmem>>, vector<32x1xf32>
    %26 = vector.extract_strided_slice %23 {offsets = [0, 0], sizes = [32, 16], strides = [1, 1]} : vector<64x16xf32> to vector<32x16xf32>
    %27 = vector.broadcast %24 : vector<32x1xf32> to vector<32x16xf32>
    %28 = arith.mulf %26, %27 : vector<32x16xf32>
    %c0_18 = arith.constant 0 : index
    %c0_19 = arith.constant 0 : index
    %c0_20 = arith.constant 0 : index
    %29 = vector.load %arg8[%c0_18, %c0_19, %c0_20] : memref<1x32x16xf32, #tpu.memory_space<vmem>>, vector<1x32x16xf32>
    %30 = vector.shape_cast %29 : vector<1x32x16xf32> to vector<32x16xf32>
    %31 = vector.shape_cast %28 : vector<32x16xf32> to vector<1x32x16xf32>
    tpu.vector_store %arg8[%c0_18, %c0_19, %c0_20], %31 {strides = array<i32>} : memref<1x32x16xf32, #tpu.memory_space<vmem>>, vector<1x32x16xf32>,
    %32 = vector.extract_strided_slice %23 {offsets = [32, 0], sizes = [32, 16], strides = [1, 1]} : vector<64x16xf32> to vector<32x16xf32>
    %33 = vector.broadcast %24 : vector<32x1xf32> to vector<32x16xf32>
    %34 = arith.mulf %32, %33 : vector<32x16xf32>
    %35 = vector.broadcast %25 : vector<32x1xf32> to vector<32x16xf32>
    %36 = arith.addf %34, %35 : vector<32x16xf32>
    %c0_21 = arith.constant 0 : index
    %c0_22 = arith.constant 0 : index
    %c0_23 = arith.constant 0 : index
    %37 = vector.load %arg9[%c0_21, %c0_22, %c0_23] : memref<1x32x16xf32, #tpu.memory_space<vmem>>, vector<1x32x16xf32>
    %38 = vector.shape_cast %37 : vector<1x32x16xf32> to vector<32x16xf32>
    %39 = vector.shape_cast %36 : vector<32x16xf32> to vector<1x32x16xf32>
    tpu.vector_store %arg9[%c0_21, %c0_22, %c0_23], %39 {strides = array<i32>} : memref<1x32x16xf32, #tpu.memory_space<vmem>>, vector<1x32x16xf32>,
    return
  }
  func.func @transform_0(%arg0: i32, %arg1: i32) -> (i32, i32, i32) {
    %c0_i32 = arith.constant 0 : i32
    %c0_i32_0 = arith.constant 0 : i32
    return %arg0, %c0_i32, %arg1 : i32, i32, i32
  }
  func.func @transform_1(%arg0: i32, %arg1: i32) -> (i32, i32, i32) {
    %c0_i32 = arith.constant 0 : i32
    %c0_i32_0 = arith.constant 0 : i32
    %c0_i32_1 = arith.constant 0 : i32
    return %arg0, %c0_i32, %c0_i32_0 : i32, i32, i32
  }
  func.func @transform_2(%arg0: i32, %arg1: i32) -> (i32, i32) {
    %c0_i32 = arith.constant 0 : i32
    %c0_i32_0 = arith.constant 0 : i32
    %c0_i32_1 = arith.constant 0 : i32
    return %c0_i32, %c0_i32_0 : i32, i32
  }
  func.func @transform_3(%arg0: i32, %arg1: i32) -> (i32, i32) {
    %c0_i32 = arith.constant 0 : i32
    %c0_i32_0 = arith.constant 0 : i32
    %c0_i32_1 = arith.constant 0 : i32
    return %c0_i32, %c0_i32_0 : i32, i32
  }
  func.func @transform_4(%arg0: i32, %arg1: i32) -> (i32, i32) {
    %c0_i32 = arith.constant 0 : i32
    %c0_i32_0 = arith.constant 0 : i32
    %c0_i32_1 = arith.constant 0 : i32
    return %c0_i32, %c0_i32_0 : i32, i32
  }
  func.func @transform_5(%arg0: i32, %arg1: i32) -> (i32, i32, i32) {
    %c0_i32 = arith.constant 0 : i32
    %c0_i32_0 = arith.constant 0 : i32
    return %arg0, %arg1, %c0_i32 : i32, i32, i32
  }
  func.func @transform_6(%arg0: i32, %arg1: i32) -> (i32, i32, i32) {
    %c0_i32 = arith.constant 0 : i32
    %c0_i32_0 = arith.constant 0 : i32
    return %arg0, %c0_i32, %arg1 : i32, i32, i32
  }
  func.func @transform_7(%arg0: i32, %arg1: i32) -> (i32, i32, i32) {
    %c0_i32 = arith.constant 0 : i32
    %c0_i32_0 = arith.constant 0 : i32
    return %arg0, %c0_i32, %arg1 : i32, i32, i32
  }
}

module attributes {stable_mosaic.version = 11 : i64} {
  func.func @edge_combine_kernel(%arg0: i32, %arg1: i32, %arg2: memref<1x1x32x16xf32, #tpu.memory_space<vmem>>, %arg3: memref<1x32x16xf32, #tpu.memory_space<vmem>>, %arg4: memref<1x32x16xf32, #tpu.memory_space<vmem>>) attributes {dimension_semantics = [#tpu.dimension_semantics<parallel>, #tpu.dimension_semantics<arbitrary>], iteration_bounds = array<i64: 2, 4>, scalar_prefetch = 0 : i64, scratch_operands = 0 : i64, tpu.core_type = #tpu.core_type<tc>, window_params = [{transform_indices = @transform_0, window_bounds = array<i64: 1, 1, 32, 16>}, {transform_indices = @transform_1, window_bounds = array<i64: 1, 32, 16>}, {transform_indices = @transform_2, window_bounds = array<i64: 1, 32, 16>}]} {
    %c0 = arith.constant 0 : index
    %c0_0 = arith.constant 0 : index
    %c0_1 = arith.constant 0 : index
    %c0_2 = arith.constant 0 : index
    %0 = vector.load %arg2[%c0, %c0_0, %c0_1, %c0_2] : memref<1x1x32x16xf32, #tpu.memory_space<vmem>>, vector<1x1x32x16xf32>
    %1 = vector.shape_cast %0 : vector<1x1x32x16xf32> to vector<32x16xf32>
    %c0_3 = arith.constant 0 : index
    %c0_4 = arith.constant 0 : index
    %c0_5 = arith.constant 0 : index
    %2 = vector.load %arg3[%c0_3, %c0_4, %c0_5] : memref<1x32x16xf32, #tpu.memory_space<vmem>>, vector<1x32x16xf32>
    %3 = vector.shape_cast %2 : vector<1x32x16xf32> to vector<32x16xf32>
    %4 = arith.addf %1, %3 : vector<32x16xf32>
    %cst = arith.constant 0.000000e+00 : f32
    %5 = vector.broadcast %cst : f32 to vector<32x16xf32>
    %6 = arith.cmpf ogt, %4, %5 : vector<32x16xf32>
    %cst_6 = arith.constant 2.000000e-01 : f32
    %7 = vector.broadcast %cst_6 : f32 to vector<32x16xf32>
    %8 = arith.mulf %7, %4 : vector<32x16xf32>
    %9 = arith.select %6, %4, %8 : vector<32x16xi1>, vector<32x16xf32>
    %c0_i32 = arith.constant 0 : i32
    %10 = arith.cmpi eq, %arg1, %c0_i32 : i32
    %11 = arith.extui %10 : i1 to i32
    %c0_i32_7 = arith.constant 0 : i32
    %12 = arith.cmpi ne, %11, %c0_i32_7 : i32
    scf.if %12 {
      %c0_10 = arith.constant 0 : index
      %c0_11 = arith.constant 0 : index
      %c0_12 = arith.constant 0 : index
      %16 = vector.load %arg4[%c0_10, %c0_11, %c0_12] : memref<1x32x16xf32, #tpu.memory_space<vmem>>, vector<1x32x16xf32>
      %17 = vector.shape_cast %16 : vector<1x32x16xf32> to vector<32x16xf32>
      %18 = vector.shape_cast %9 : vector<32x16xf32> to vector<1x32x16xf32>
      tpu.vector_store %arg4[%c0_10, %c0_11, %c0_12], %18 {strides = array<i32>} : memref<1x32x16xf32, #tpu.memory_space<vmem>>, vector<1x32x16xf32>,
    } else {
    }
    %c0_i32_8 = arith.constant 0 : i32
    %13 = arith.cmpi sgt, %arg1, %c0_i32_8 : i32
    %14 = arith.extui %13 : i1 to i32
    %c0_i32_9 = arith.constant 0 : i32
    %15 = arith.cmpi ne, %14, %c0_i32_9 : i32
    scf.if %15 {
      %c0_10 = arith.constant 0 : index
      %c0_11 = arith.constant 0 : index
      %c0_12 = arith.constant 0 : index
      %16 = vector.load %arg4[%c0_10, %c0_11, %c0_12] : memref<1x32x16xf32, #tpu.memory_space<vmem>>, vector<1x32x16xf32>
      %17 = vector.shape_cast %16 : vector<1x32x16xf32> to vector<32x16xf32>
      %18 = arith.maximumf %17, %9 : vector<32x16xf32>
      %c0_13 = arith.constant 0 : index
      %c0_14 = arith.constant 0 : index
      %c0_15 = arith.constant 0 : index
      %19 = vector.load %arg4[%c0_13, %c0_14, %c0_15] : memref<1x32x16xf32, #tpu.memory_space<vmem>>, vector<1x32x16xf32>
      %20 = vector.shape_cast %19 : vector<1x32x16xf32> to vector<32x16xf32>
      %21 = vector.shape_cast %18 : vector<32x16xf32> to vector<1x32x16xf32>
      tpu.vector_store %arg4[%c0_13, %c0_14, %c0_15], %21 {strides = array<i32>} : memref<1x32x16xf32, #tpu.memory_space<vmem>>, vector<1x32x16xf32>,
    } else {
    }
    return
  }
  func.func @transform_0(%arg0: i32, %arg1: i32) -> (i32, i32, i32, i32) {
    %c0_i32 = arith.constant 0 : i32
    %c0_i32_0 = arith.constant 0 : i32
    %c0_i32_1 = arith.constant 0 : i32
    return %arg0, %arg1, %c0_i32, %c0_i32_0 : i32, i32, i32, i32
  }
  func.func @transform_1(%arg0: i32, %arg1: i32) -> (i32, i32, i32) {
    %c0_i32 = arith.constant 0 : i32
    %c0_i32_0 = arith.constant 0 : i32
    %c0_i32_1 = arith.constant 0 : i32
    return %arg0, %c0_i32, %c0_i32_0 : i32, i32, i32
  }
  func.func @transform_2(%arg0: i32, %arg1: i32) -> (i32, i32, i32) {
    %c0_i32 = arith.constant 0 : i32
    %c0_i32_0 = arith.constant 0 : i32
    %c0_i32_1 = arith.constant 0 : i32
    return %arg0, %c0_i32, %c0_i32_0 : i32, i32, i32
  }
}

module attributes {stable_mosaic.version = 11 : i64} {
  func.func @conv5_pool_kernel(%arg0: i32, %arg1: memref<1x48x16xf32, #tpu.memory_space<vmem>>, %arg2: memref<48x32xbf16, #tpu.memory_space<vmem>>, %arg3: memref<1x32xf32, #tpu.memory_space<vmem>>, %arg4: memref<1x32xf32, #tpu.memory_space<vmem>>, %arg5: memref<1x1x64xf32, #tpu.memory_space<vmem>>) attributes {dimension_semantics = [#tpu.dimension_semantics<parallel>], iteration_bounds = array<i64: 2>, scalar_prefetch = 0 : i64, scratch_operands = 0 : i64, tpu.core_type = #tpu.core_type<tc>, window_params = [{transform_indices = @transform_0, window_bounds = array<i64: 1, 48, 16>}, {pipeline_mode = #tpu.pipeline_mode<synchronous>, transform_indices = @transform_1, window_bounds = array<i64: 48, 32>}, {pipeline_mode = #tpu.pipeline_mode<synchronous>, transform_indices = @transform_2, window_bounds = array<i64: 1, 32>}, {pipeline_mode = #tpu.pipeline_mode<synchronous>, transform_indices = @transform_3, window_bounds = array<i64: 1, 32>}, {transform_indices = @transform_4, window_bounds = array<i64: 1, 1, 64>}]} {
    %c0 = arith.constant 0 : index
    %c0_0 = arith.constant 0 : index
    %c0_1 = arith.constant 0 : index
    %0 = vector.load %arg1[%c0, %c0_0, %c0_1] : memref<1x48x16xf32, #tpu.memory_space<vmem>>, vector<1x48x16xf32>
    %1 = vector.shape_cast %0 : vector<1x48x16xf32> to vector<48x16xf32>
    %2 = arith.truncf %1 : vector<48x16xf32> to vector<48x16xbf16>
    %c0_2 = arith.constant 0 : index
    %c0_3 = arith.constant 0 : index
    %3 = vector.load %arg2[%c0_2, %c0_3] : memref<48x32xbf16, #tpu.memory_space<vmem>>, vector<48x32xbf16>
    %cst = arith.constant dense<0.000000e+00> : vector<16x32xf32>
    %4 = tpu.matmul %2, %3, %cst {dimension_numbers = #tpu.dot_dimension_numbers<[0], [0], [1], [1], [0, 1, 1, 1], [], []>} : vector<48x16xbf16>, vector<48x32xbf16>, vector<16x32xf32> -> vector<16x32xf32>
    %c0_4 = arith.constant 0 : index
    %c0_5 = arith.constant 0 : index
    %5 = vector.load %arg3[%c0_4, %c0_5] : memref<1x32xf32, #tpu.memory_space<vmem>>, vector<1x32xf32>
    %6 = vector.broadcast %5 : vector<1x32xf32> to vector<16x32xf32>
    %7 = arith.mulf %4, %6 : vector<16x32xf32>
    %c0_6 = arith.constant 0 : index
    %c0_7 = arith.constant 0 : index
    %8 = vector.load %arg4[%c0_6, %c0_7] : memref<1x32xf32, #tpu.memory_space<vmem>>, vector<1x32xf32>
    %9 = vector.broadcast %8 : vector<1x32xf32> to vector<16x32xf32>
    %10 = arith.addf %7, %9 : vector<16x32xf32>
    %cst_8 = arith.constant 0.000000e+00 : f32
    %11 = vector.broadcast %cst_8 : f32 to vector<16x32xf32>
    %12 = arith.cmpf ogt, %10, %11 : vector<16x32xf32>
    %cst_9 = arith.constant 2.000000e-01 : f32
    %13 = vector.broadcast %cst_9 : f32 to vector<16x32xf32>
    %14 = arith.mulf %13, %10 : vector<16x32xf32>
    %15 = arith.select %12, %10, %14 : vector<16x32xi1>, vector<16x32xf32>
    %cst_10 = arith.constant dense<0xFF800000> : vector<32xf32>
    %16 = vector.multi_reduction <maximumf>, %15, %cst_10 [0] : vector<16x32xf32> to vector<32xf32>
    %17 = vector.shape_cast %16 : vector<32xf32> to vector<1x32xf32>
    %cst_11 = arith.constant dense<0.000000e+00> : vector<32xf32>
    %18 = vector.multi_reduction <add>, %15, %cst_11 [0] : vector<16x32xf32> to vector<32xf32>
    %19 = vector.shape_cast %18 : vector<32xf32> to vector<1x32xf32>
    %cst_12 = arith.constant 1.600000e+01 : f32
    %20 = vector.broadcast %cst_12 : f32 to vector<1x32xf32>
    %21 = arith.divf %19, %20 : vector<1x32xf32>
    %22 = tpu.concatenate %17, %21 in 1 : vector<1x32xf32>, vector<1x32xf32> -> vector<1x64xf32>
    %c0_13 = arith.constant 0 : index
    %c0_14 = arith.constant 0 : index
    %c0_15 = arith.constant 0 : index
    %23 = vector.load %arg5[%c0_13, %c0_14, %c0_15] : memref<1x1x64xf32, #tpu.memory_space<vmem>>, vector<1x1x64xf32>
    %24 = vector.shape_cast %23 : vector<1x1x64xf32> to vector<1x64xf32>
    %25 = vector.shape_cast %22 : vector<1x64xf32> to vector<1x1x64xf32>
    tpu.vector_store %arg5[%c0_13, %c0_14, %c0_15], %25 {strides = array<i32>} : memref<1x1x64xf32, #tpu.memory_space<vmem>>, vector<1x1x64xf32>,
    return
  }
  func.func @transform_0(%arg0: i32) -> (i32, i32, i32) {
    %c0_i32 = arith.constant 0 : i32
    %c0_i32_0 = arith.constant 0 : i32
    %c0_i32_1 = arith.constant 0 : i32
    return %arg0, %c0_i32, %c0_i32_0 : i32, i32, i32
  }
  func.func @transform_1(%arg0: i32) -> (i32, i32) {
    %c0_i32 = arith.constant 0 : i32
    %c0_i32_0 = arith.constant 0 : i32
    %c0_i32_1 = arith.constant 0 : i32
    return %c0_i32, %c0_i32_0 : i32, i32
  }
  func.func @transform_2(%arg0: i32) -> (i32, i32) {
    %c0_i32 = arith.constant 0 : i32
    %c0_i32_0 = arith.constant 0 : i32
    %c0_i32_1 = arith.constant 0 : i32
    return %c0_i32, %c0_i32_0 : i32, i32
  }
  func.func @transform_3(%arg0: i32) -> (i32, i32) {
    %c0_i32 = arith.constant 0 : i32
    %c0_i32_0 = arith.constant 0 : i32
    %c0_i32_1 = arith.constant 0 : i32
    return %c0_i32, %c0_i32_0 : i32, i32
  }
  func.func @transform_4(%arg0: i32) -> (i32, i32, i32) {
    %c0_i32 = arith.constant 0 : i32
    %c0_i32_0 = arith.constant 0 : i32
    %c0_i32_1 = arith.constant 0 : i32
    return %arg0, %c0_i32, %c0_i32_0 : i32, i32, i32
  }
}

module attributes {stable_mosaic.version = 11 : i64} {
  func.func @head_kernel(%arg0: i32, %arg1: memref<2x64xf32, #tpu.memory_space<vmem>>, %arg2: memref<64x512xbf16, #tpu.memory_space<vmem>>, %arg3: memref<1x512xf32, #tpu.memory_space<vmem>>, %arg4: memref<1x512xf32, #tpu.memory_space<vmem>>, %arg5: memref<512x256xbf16, #tpu.memory_space<vmem>>, %arg6: memref<1x256xf32, #tpu.memory_space<vmem>>, %arg7: memref<1x256xf32, #tpu.memory_space<vmem>>, %arg8: memref<1x256xf32, #tpu.memory_space<vmem>>, %arg9: memref<256x3xbf16, #tpu.memory_space<vmem>>, %arg10: memref<1x3xf32, #tpu.memory_space<vmem>>, %arg11: memref<2x3xf32, #tpu.memory_space<vmem>>) attributes {dimension_semantics = [#tpu.dimension_semantics<arbitrary>], iteration_bounds = array<i64: 1>, scalar_prefetch = 0 : i64, scratch_operands = 0 : i64, tpu.core_type = #tpu.core_type<tc>, window_params = [{pipeline_mode = #tpu.pipeline_mode<synchronous>, transform_indices = @transform_0, window_bounds = array<i64: 2, 64>}, {pipeline_mode = #tpu.pipeline_mode<synchronous>, transform_indices = @transform_1, window_bounds = array<i64: 64, 512>}, {pipeline_mode = #tpu.pipeline_mode<synchronous>, transform_indices = @transform_2, window_bounds = array<i64: 1, 512>}, {pipeline_mode = #tpu.pipeline_mode<synchronous>, transform_indices = @transform_3, window_bounds = array<i64: 1, 512>}, {pipeline_mode = #tpu.pipeline_mode<synchronous>, transform_indices = @transform_4, window_bounds = array<i64: 512, 256>}, {pipeline_mode = #tpu.pipeline_mode<synchronous>, transform_indices = @transform_5, window_bounds = array<i64: 1, 256>}, {pipeline_mode = #tpu.pipeline_mode<synchronous>, transform_indices = @transform_6, window_bounds = array<i64: 1, 256>}, {pipeline_mode = #tpu.pipeline_mode<synchronous>, transform_indices = @transform_7, window_bounds = array<i64: 1, 256>}, {pipeline_mode = #tpu.pipeline_mode<synchronous>, transform_indices = @transform_8, window_bounds = array<i64: 256, 3>}, {pipeline_mode = #tpu.pipeline_mode<synchronous>, transform_indices = @transform_9, window_bounds = array<i64: 1, 3>}, {pipeline_mode = #tpu.pipeline_mode<synchronous>, transform_indices = @transform_10, window_bounds = array<i64: 2, 3>}]} {
    %c0 = arith.constant 0 : index
    %c0_0 = arith.constant 0 : index
    %0 = vector.load %arg1[%c0, %c0_0] : memref<2x64xf32, #tpu.memory_space<vmem>>, vector<2x64xf32>
    %1 = arith.truncf %0 : vector<2x64xf32> to vector<2x64xbf16>
    %c0_1 = arith.constant 0 : index
    %c0_2 = arith.constant 0 : index
    %2 = vector.load %arg2[%c0_1, %c0_2] : memref<64x512xbf16, #tpu.memory_space<vmem>>, vector<64x512xbf16>
    %cst = arith.constant dense<0.000000e+00> : vector<2x512xf32>
    %3 = tpu.matmul %1, %2, %cst {dimension_numbers = #tpu.dot_dimension_numbers<[1], [0], [0], [1], [0, 0, 1, 1], [], []>} : vector<2x64xbf16>, vector<64x512xbf16>, vector<2x512xf32> -> vector<2x512xf32>
    %c0_3 = arith.constant 0 : index
    %c0_4 = arith.constant 0 : index
    %4 = vector.load %arg3[%c0_3, %c0_4] : memref<1x512xf32, #tpu.memory_space<vmem>>, vector<1x512xf32>
    %5 = vector.broadcast %4 : vector<1x512xf32> to vector<2x512xf32>
    %6 = arith.mulf %3, %5 : vector<2x512xf32>
    %c0_5 = arith.constant 0 : index
    %c0_6 = arith.constant 0 : index
    %7 = vector.load %arg4[%c0_5, %c0_6] : memref<1x512xf32, #tpu.memory_space<vmem>>, vector<1x512xf32>
    %8 = vector.broadcast %7 : vector<1x512xf32> to vector<2x512xf32>
    %9 = arith.addf %6, %8 : vector<2x512xf32>
    %cst_7 = arith.constant 0.000000e+00 : f32
    %10 = vector.broadcast %cst_7 : f32 to vector<2x512xf32>
    %11 = arith.cmpf ogt, %9, %10 : vector<2x512xf32>
    %cst_8 = arith.constant 2.000000e-01 : f32
    %12 = vector.broadcast %cst_8 : f32 to vector<2x512xf32>
    %13 = arith.mulf %12, %9 : vector<2x512xf32>
    %14 = arith.select %11, %9, %13 : vector<2x512xi1>, vector<2x512xf32>
    %15 = arith.truncf %14 : vector<2x512xf32> to vector<2x512xbf16>
    %c0_9 = arith.constant 0 : index
    %c0_10 = arith.constant 0 : index
    %16 = vector.load %arg5[%c0_9, %c0_10] : memref<512x256xbf16, #tpu.memory_space<vmem>>, vector<512x256xbf16>
    %cst_11 = arith.constant dense<0.000000e+00> : vector<2x256xf32>
    %17 = tpu.matmul %15, %16, %cst_11 {dimension_numbers = #tpu.dot_dimension_numbers<[1], [0], [0], [1], [0, 0, 1, 1], [], []>} : vector<2x512xbf16>, vector<512x256xbf16>, vector<2x256xf32> -> vector<2x256xf32>
    %c0_12 = arith.constant 0 : index
    %c0_13 = arith.constant 0 : index
    %18 = vector.load %arg6[%c0_12, %c0_13] : memref<1x256xf32, #tpu.memory_space<vmem>>, vector<1x256xf32>
    %19 = vector.broadcast %18 : vector<1x256xf32> to vector<2x256xf32>
    %20 = arith.addf %17, %19 : vector<2x256xf32>
    %c0_14 = arith.constant 0 : index
    %c0_15 = arith.constant 0 : index
    %21 = vector.load %arg7[%c0_14, %c0_15] : memref<1x256xf32, #tpu.memory_space<vmem>>, vector<1x256xf32>
    %22 = vector.broadcast %21 : vector<1x256xf32> to vector<2x256xf32>
    %23 = arith.mulf %20, %22 : vector<2x256xf32>
    %c0_16 = arith.constant 0 : index
    %c0_17 = arith.constant 0 : index
    %24 = vector.load %arg8[%c0_16, %c0_17] : memref<1x256xf32, #tpu.memory_space<vmem>>, vector<1x256xf32>
    %25 = vector.broadcast %24 : vector<1x256xf32> to vector<2x256xf32>
    %26 = arith.addf %23, %25 : vector<2x256xf32>
    %cst_18 = arith.constant 0.000000e+00 : f32
    %27 = vector.broadcast %cst_18 : f32 to vector<2x256xf32>
    %28 = arith.cmpf ogt, %26, %27 : vector<2x256xf32>
    %cst_19 = arith.constant 2.000000e-01 : f32
    %29 = vector.broadcast %cst_19 : f32 to vector<2x256xf32>
    %30 = arith.mulf %29, %26 : vector<2x256xf32>
    %31 = arith.select %28, %26, %30 : vector<2x256xi1>, vector<2x256xf32>
    %32 = arith.truncf %31 : vector<2x256xf32> to vector<2x256xbf16>
    %c0_20 = arith.constant 0 : index
    %c0_21 = arith.constant 0 : index
    %33 = vector.load %arg9[%c0_20, %c0_21] : memref<256x3xbf16, #tpu.memory_space<vmem>>, vector<256x3xbf16>
    %cst_22 = arith.constant dense<0.000000e+00> : vector<2x3xf32>
    %34 = tpu.matmul %32, %33, %cst_22 {dimension_numbers = #tpu.dot_dimension_numbers<[1], [0], [0], [1], [0, 0, 1, 1], [], []>} : vector<2x256xbf16>, vector<256x3xbf16>, vector<2x3xf32> -> vector<2x3xf32>
    %c0_23 = arith.constant 0 : index
    %c0_24 = arith.constant 0 : index
    %35 = vector.load %arg10[%c0_23, %c0_24] : memref<1x3xf32, #tpu.memory_space<vmem>>, vector<1x3xf32>
    %36 = vector.broadcast %35 : vector<1x3xf32> to vector<2x3xf32>
    %37 = arith.addf %34, %36 : vector<2x3xf32>
    %c0_25 = arith.constant 0 : index
    %c0_26 = arith.constant 0 : index
    %38 = vector.load %arg11[%c0_25, %c0_26] : memref<2x3xf32, #tpu.memory_space<vmem>>, vector<2x3xf32>
    tpu.vector_store %arg11[%c0_25, %c0_26], %37 {strides = array<i32>} : memref<2x3xf32, #tpu.memory_space<vmem>>, vector<2x3xf32>,
    return
  }
  func.func @transform_0(%arg0: i32) -> (i32, i32) {
    %c0_i32 = arith.constant 0 : i32
    %c0_i32_0 = arith.constant 0 : i32
    %c0_i32_1 = arith.constant 0 : i32
    return %c0_i32, %c0_i32_0 : i32, i32
  }
  func.func @transform_1(%arg0: i32) -> (i32, i32) {
    %c0_i32 = arith.constant 0 : i32
    %c0_i32_0 = arith.constant 0 : i32
    %c0_i32_1 = arith.constant 0 : i32
    return %c0_i32, %c0_i32_0 : i32, i32
  }
  func.func @transform_2(%arg0: i32) -> (i32, i32) {
    %c0_i32 = arith.constant 0 : i32
    %c0_i32_0 = arith.constant 0 : i32
    %c0_i32_1 = arith.constant 0 : i32
    return %c0_i32, %c0_i32_0 : i32, i32
  }
  func.func @transform_3(%arg0: i32) -> (i32, i32) {
    %c0_i32 = arith.constant 0 : i32
    %c0_i32_0 = arith.constant 0 : i32
    %c0_i32_1 = arith.constant 0 : i32
    return %c0_i32, %c0_i32_0 : i32, i32
  }
  func.func @transform_4(%arg0: i32) -> (i32, i32) {
    %c0_i32 = arith.constant 0 : i32
    %c0_i32_0 = arith.constant 0 : i32
    %c0_i32_1 = arith.constant 0 : i32
    return %c0_i32, %c0_i32_0 : i32, i32
  }
  func.func @transform_5(%arg0: i32) -> (i32, i32) {
    %c0_i32 = arith.constant 0 : i32
    %c0_i32_0 = arith.constant 0 : i32
    %c0_i32_1 = arith.constant 0 : i32
    return %c0_i32, %c0_i32_0 : i32, i32
  }
  func.func @transform_6(%arg0: i32) -> (i32, i32) {
    %c0_i32 = arith.constant 0 : i32
    %c0_i32_0 = arith.constant 0 : i32
    %c0_i32_1 = arith.constant 0 : i32
    return %c0_i32, %c0_i32_0 : i32, i32
  }
  func.func @transform_7(%arg0: i32) -> (i32, i32) {
    %c0_i32 = arith.constant 0 : i32
    %c0_i32_0 = arith.constant 0 : i32
    %c0_i32_1 = arith.constant 0 : i32
    return %c0_i32, %c0_i32_0 : i32, i32
  }
  func.func @transform_8(%arg0: i32) -> (i32, i32) {
    %c0_i32 = arith.constant 0 : i32
    %c0_i32_0 = arith.constant 0 : i32
    %c0_i32_1 = arith.constant 0 : i32
    return %c0_i32, %c0_i32_0 : i32, i32
  }
  func.func @transform_9(%arg0: i32) -> (i32, i32) {
    %c0_i32 = arith.constant 0 : i32
    %c0_i32_0 = arith.constant 0 : i32
    %c0_i32_1 = arith.constant 0 : i32
    return %c0_i32, %c0_i32_0 : i32, i32
  }
  func.func @transform_10(%arg0: i32) -> (i32, i32) {
    %c0_i32 = arith.constant 0 : i32
    %c0_i32_0 = arith.constant 0 : i32
    %c0_i32_1 = arith.constant 0 : i32
    return %c0_i32, %c0_i32_0 : i32, i32
  }
}

</mosaic_0001>

<bundles_post_ra>
// kernel: dgcnn_forward.7
= control target key start
LH: loop header
LB: loop body
LE: loop exit
PB: predicated region body
PF: predicated region fallthrough
CT: control target
= control target key end

     0   :  { %s420_s9 = smov 0   ;;  %s422_s10 = smov 0   ;;  %s480_s0 = inlined_call_operand.vmem [shape: f32[2,4,16,16], index: 0, kind: input, shape index: {}]   ;;  %s481_s1 = inlined_call_operand.vmem [shape: f32[2,16,16], index: 1, kind: input, shape index: {}]   ;;  %s482_s2 = inlined_call_operand.vmem [shape: f32[2,16,16], index: 2, kind: output, shape index: {}]  }
   0x1   :  { %s424_s11 = smov 0   ;;  %s426_s12 = smov 0  }
   0x2   :  { %s428_s13 = smov 0  }
   0x3 LB: > { %s21_s14 = sadd.s32 1, %s395_s11  ;;  %s24_s15 = sadd.s32 1, %s399_s12  ;;  %s403_s13 = sphi %s428_s13, %s12_s13   ;;  %s399_s12 = sphi %s426_s12, %s486_s12   ;;  %s395_s11 = sphi %s424_s11, %s485_s11   ;;  %s391_s10 = sphi %s422_s10, %s484_s10   ;;  %s387_s9 = sphi %s420_s9, %s483_s9  }
   0x4   : > { %p22_p0 = scmp.ge.s32.totalorder %s21_s14, 4  ;;  %p311_p1 = scmp.ge.s32.totalorder %s403_s13, 1 }
   0x5   : > { %p140_p2 = scmp.lt.s32.totalorder %s403_s13, 9 }
   0x6   : > { %s488_s14 = smov (%p22_p0, %s21_s14), 0  ;;  %s490_s15 = smov (!%p22_p0, %s24_s15), %s399_s12 }
   0x7   : > { %p141_p3 = pnand %p311_p1, %p140_p2  ;;  %p26_p4 = scmp.ge.s32.totalorder %s490_s15, 2 }
   0x8   : > { %p171_p5 = scmp.lt.s32.totalorder (!%p141_p3), %s391_s10, 1  ;;  %p173_p6 = scmp.lt.s32.totalorder (!%p141_p3), %s387_s9, 3 }
   0x9   : > { %s492_s15 = smov (%p26_p4, %s490_s15), 0  ;;  %144 = sbr.rel (%p141_p3) target bundleno = 40 (0x28), region = 28 }
   0xa   : > { %p319_p7 = scmp.ne.s32.totalorder (!%p141_p3), %s387_s9, 0 }
  0x10   : > { %s494_s10 = smov (!%p171_p5, %s391_s10), 1  ;;  %vm206_vm2 = vcmask (!%p319_p7), 130048  }
  0x11   : > { %s174_s16 = scalar_select %p173_p6, %s387_s9, 3 }
  0x12   : > { %s313_s17 = sshll.u32 %s494_s10, 3  ;;  %s323_s18 = sshll.u32 %s494_s10, 4 }
  0x13   : > { %s312_s19 = sshll.u32 %s174_s16, 1  ;;  %s184_s22 = scalar_lea.vmem %s481_s1, %s323_s18 }
  0x14   : > { %s177_s23 = sadd.s32 %s313_s17, %s312_s19  ;;  %s189_s26 = scalar_lea.vmem %s482_s2, %s323_s18  ;;  %v192_v0 = vld [vmem:[%s184_s22] sm:$0xff]  ;;  %v193_v1 = vld [vmem:[%s184_s22 + $0x8] sm:$0xff] }
  0x15   : > { %s314_s27 = sshll.u32 %s177_s23, 3 }
  0x16   : > { %s179_s30 = scalar_lea.vmem %s480_s0, %s314_s27  ;;  %205 = sbr.rel (%p319_p7) target bundleno = 30 (0x1e), region = 32 }
  0x17   : > { %v190_v2 = vld [vmem:[%s179_s30] sm:$0xff]  ;;  %v191_v3 = vld [vmem:[%s179_s30 + $0x8] sm:$0xff] }
  0x18   : > { %v194_v4 = vadd.f32 %v192_v0, %v190_v2  ;;  %v195_v5 = vadd.f32 %v193_v1, %v191_v3 }
  0x1a   : > { %vm196_vm0 = vcmp.gt.f32.partialorder %v194_v4, 0.0  ;;  %vm197_vm1 = vcmp.gt.f32.partialorder %v195_v5, 0.0  ;;  %v198_v6 = vmul.f32 0.2, %v194_v4  ;;  %v199_v7 = vmul.f32 0.2, %v195_v5 }
  0x1c   : > { %v200_v8 = vsel %vm196_vm0, %v194_v4, %v198_v6  ;;  %v201_v9 = vsel %vm197_vm1, %v195_v5, %v199_v7 }
  0x1d   : > { %207 = vst.msk [vmem:[%s189_s26] sm:$0xff] %vm206_vm2, %v200_v8  ;;  %208 = vst.msk [vmem:[%s189_s26 + $0x8] sm:$0xff] %vm206_vm2, %v201_v9 }
  0x1e PF: > { %p320_p8 = scmp.le.s32.totalorder %s387_s9, 0 }
  0x1f   : > { %vm217_vm3 = vcmask (!%p320_p8), 130048  }
  0x20   : > { %212 = sbr.rel (%p320_p8) target bundleno = 40 (0x28), region = 36 }
  0x24   : > { %v213_v10 = vld [vmem:[%s189_s26] sm:$0xff] (!%p320_p8)  ;;  %v214_v11 = vld [vmem:[%s189_s26 + $0x8] sm:$0xff] (!%p320_p8) }
  0x25   : > { %v215_v12 = vmax.f32 (!%p320_p8), %v213_v10, %v200_v8  ;;  %v216_v13 = vmax.f32 (!%p320_p8), %v214_v11, %v201_v9 }
  0x27   : > { %218 = vst.msk [vmem:[%s189_s26] sm:$0xff] %vm217_vm3, %v215_v12  ;;  %219 = vst.msk [vmem:[%s189_s26 + $0x8] sm:$0xff] %vm217_vm3, %v216_v13 }
  0x28 PF: > { %s12_s13 = sadd.s32 1, %s403_s13   ;;  %s483_s9 = smov %s395_s11 }
  0x29   : > { %p9_p9 = scmp.ge.s32.totalorder %s12_s13, 10   ;;  %s484_s10 = smov %s399_s12 }
  0x2a   : > { %s485_s11 = smov %s488_s14  ;;  %s486_s12 = smov %s492_s15 }
  0x2b   :  { %11 = sbr.rel (!%p9_p9) target bundleno = 3 (0x3), region = 69 }

// kernel: dgcnn_forward.6
= control target key start
LH: loop header
LB: loop body
LE: loop exit
PB: predicated region body
PF: predicated region fallthrough
CT: control target
= control target key end

     0   :  { %s997_s24 = smov 0   ;;  %s999_s25 = smov 0   ;;  %s1078_s0 = inlined_call_operand.vmem [shape: f32[2,3,16], index: 0, kind: input, shape index: {}, may-alias: {0,1}]   ;;  %s1079_s1 = inlined_call_operand.vmem [shape: f32[2,3,16], index: 1, kind: input, shape index: {}, may-alias: {0,1}]   ;;  %s1080_s2 = inlined_call_operand.vmem [shape: bf16[32,3], index: 2, kind: input, shape index: {}]   ;;  %s1081_s3 = inlined_call_operand.vmem [shape: f32[16,1], index: 3, kind: input, shape index: {}]   ;;  %s1082_s4 = inlined_call_operand.vmem [shape: f32[16,1], index: 4, kind: input, shape index: {}]   ;;  %s1083_s5 = inlined_call_operand.vmem [shape: f32[2,16,16], index: 5, kind: output, shape index: {0}]   ;;  %s1084_s6 = inlined_call_operand.vmem [shape: f32[2,16,16], index: 6, kind: output, shape index: {1}]   ;;  %s1085_s7 = inlined_call_operand.vmem [shape: f32[2,16,16], index: 7, kind: output, shape index: {2}]  }
   0x1   :  { %s1001_s26 = smov 0  }
   0x2 LB: > { %s30_s27 = sadd.s32 1, %s949_s25  ;;  %p862_p0 = scmp.ge.s32.totalorder %s953_s26, 1  ;;  %s953_s26 = sphi %s1001_s26, %s18_s26   ;;  %s949_s25 = sphi %s999_s25, %s1087_s25   ;;  %s945_s24 = sphi %s997_s24, %s1086_s24  }
   0x3   : > { %p32_p1 = scmp.ge.s32.totalorder %s30_s27, 2  ;;  %p273_p2 = scmp.lt.s32.totalorder %s953_s26, 3 }
   0x5   : > { %s1089_s27 = smov (%p32_p1, %s30_s27), 0  ;;  %p274_p3 = pnand %p862_p0, %p273_p2 }
   0x6   : > { %p331_p4 = scmp.lt.s32.totalorder (!%p274_p3), %s945_s24, 1  ;;  %vm578_vm0 = vcmask (!%p274_p3), 1040384   ;;  %v929_v0 = vld [vmem:[%s1080_s2] sm:$0xff] (!%p274_p3)   ;;  %vm403_vm1 = vcmask (!%p274_p3), 23552   ;;  %vm579_vm2 = vcmask (!%p274_p3), 1041408   ;;  %v955_v1 = vmov (!%p274_p3), 65535  }
   0x7   : > { %277 = sbr.rel (%p274_p3) target bundleno = 371 (0x173), region = 40  ;;  %896 = vmatprep.mubr.msk.bf16.mxu1 (!%p274_p3), %vm403_vm1, %v929_v0  ;;  %v580_v2 = vsel (!%p274_p3), %vm578_vm0, 4294967295, %v955_v1  ;;  %vm490_vm3 = vcmask (!%p274_p3), 124928   ;;  %vm410_vm4 = vcmask (!%p274_p3), 1042432   ;;  %v930_v12 = vld [vmem:[%s1080_s2 + $0x8] sm:$0xff] (!%p274_p3)   ;;  %v634_v15 = vld [vmem:[%s1081_s3] sm:$0xff] (!%p274_p3) }
   0x8   : > { %v581_v4 = vsel (!%p274_p3), %vm579_vm2, %v580_v2, 0  ;;  %v956_v16 = vmov (!%p274_p3), 0   ;;  %v636_v18 = vld [vmem:[%s1082_s4] sm:$0xff] (!%p274_p3)  ;;  %v635_v22 = vld [vmem:[%s1081_s3 + $0x8] sm:$0xff] (!%p274_p3)  ;;  %vm554_vm5 = vcmask (!%p274_p3), 130048  }
   0x9   : > { %927 = vset.pattern.permute.xlu1 (!%p274_p3), %v956_v16  ;;  %v637_v27 = vld [vmem:[%s1082_s4 + $0x8] sm:$0xff] (!%p274_p3) }
   0xa   : > { %640 = vperm.xlu1 (!%p274_p3), %927, %v634_v15  }
   0xe   : > { %s1091_s24 = smov (!%p331_p4, %s945_s24), 1  ;;  %656 = vperm.xlu1 %927, %v636_v18  }
   0xf   : > { %s863_s30 = sshll.u32 %s1091_s24, 2  ;;  %s1049_s28 = sshll.u32 %s1091_s24, 4 }
  0x10   : > { %s337_s10 = scalar_lea.vmem %s1078_s0, %s863_s30  ;;  %s341_s13 = scalar_lea.vmem %s1079_s1, %s863_s30 }
  0x11   : > { %v369_v3 = vld [vmem:[%s337_s10] sm:$0x7]  ;;  %s359_s8 = scalar_lea.vmem %s1084_s6, %s1049_s28  ;;  %s367_s11 = scalar_lea.vmem %s1085_s7, %s1049_s28 }
  0x12   : > { %371 = vxpose.xlu0.b32.start.end [1/1] (short) (narrow) %v369_v3, 16  ;;  %v489_v5 = vmul.f32 %v369_v3, %v369_v3  ;;  %v561_v6 = vpack.c.bf16 %v369_v3, %v369_v3  ;;  %v370_v9 = vld [vmem:[%s341_s13] sm:$0x7]  ;;  %s350_s13 = scalar_lea.vmem %s1083_s5, %s1049_s28 }
  0x13   : > { %889 = vmatprep.subr.msk.mxu0 %vm410_vm4, %v370_v9  ;;  %v498_v11 = vmul.f32 %v370_v9, %v370_v9 }
  0x14   : > { %v491_v7 = vsel %vm490_vm3, %v489_v5, 0.0  ;;  %v583_v8 = vand.u32 %v581_v4, %v561_v6  ;;  %890 = vmatpush3.msk.msra.mxu0 %vm410_vm4, %v370_v9 }
  0x15   : > { %v492_v10 = vrot.slane %v491_v7, 4  ;;  %v499_v14 = vsel %vm490_vm3, %v498_v11, 0.0 }
  0x16   : > { %894 = vmatprep.subr.bf16.mxu1 %v583_v8  ;;  %v500_v44 = vrot.slane %v499_v14, 4 }
  0x17   : > { %v493_v13 = vadd.f32 %v492_v10, %v491_v7  ;;  %895 = vmatpush3.bf16.msra.mxu1 %v583_v8 }
  0x18   : > { %v501_v45 = vadd.f32 %v500_v44, %v499_v14 }
  0x19   : > { %v494_v17 = vrot.slane %v493_v13, 2 }
  0x1a   : > { %897 = vmatmul.mubr.msk.bf16.vlgmr.msra.gmra.mrb[0].mxu1 %vm403_vm1, %v930_v12  ;;  %v502_v46 = vrot.slane %v501_v45, 2 }
  0x1b   : > { %v495_v19 = vadd.f32 %v494_v17, %v493_v13 }
  0x1c   : > { %v503_v47 = vadd.f32 %v502_v46, %v501_v45 }
  0x1d   : > { %v496_v20 = vrot.slane %v495_v19, 1 }
  0x1e   : > { %v504_v48 = vrot.slane %v503_v47, 1 }
  0x1f   : > { %v497_v21 = vadd.f32 %v496_v20, %v495_v19 }
  0x20   : > { %v505_v50 = vadd.f32 %v504_v48, %v503_v47 }
  0x21   : > { %508 = vxpose.xlu0.b32.start.end [1/1] (short) (narrow) %v497_v21, 16 }
  0x4a   : > { %928 = vset.pattern.permute.xlu0 %v956_v16 }
  0x4e   : > { %645 = vperm.xlu0 %928, %v635_v22  }
  0x89   : > { %v641_v28 = vpop.permute.xlu1 %640 }
  0x8d   : > { %v657_v32 = vpop.permute.xlu1 %656 }
  0x92   : > { %v387_v23 = vpop.trf.xlu0 }
  0x93   : > { %891 = vmatprep.mubr.msk.f32.mxu0 %vm403_vm1, %v387_v23 }
  0x96   : > { %v388_v24 = vpop.trf.xlu0 }
  0x97   : > { %892 = vmatmul.mubr.msk.f32.vlgmr.msra.gmra.mrb[0].mxu0 %vm403_vm1, %v388_v24 }
  0xa1   : > { %v524_v25 = vpop.trf.xlu0 }
  0xa2   : > { %542 = vperm.xlu1 %927, %v524_v25  }
  0xa5   : > { %v525_v26 = vpop.trf.xlu0 }
  0xa6   : > { %547 = vperm.xlu1 %927, %v525_v26  }
  0xaa   : > { %661 = vperm.xlu1 %927, %v637_v27  }
  0xcd   : > { %v646_v36 = vpop.permute.xlu0 %645 }
  0xed   : > { %v898_v29 = vpop.f32.mrb[0].mxu1 }
  0xee   : > { %v652_v30 = vmul.f32 %v898_v29, %v641_v28  ;;  %v619_v31 = vpop.f32.mrb[1].mxu1 }
  0xef   : > { %v648_v33 = vmul.f32 %v641_v28, %v619_v31  ;;  %v899_v34 = vpop.f32.mrb[2].mxu1 }
  0xf0   : > { %v664_v35 = vadd.f32 %v657_v32, %v652_v30  ;;  %v622_v37 = vpop.f32.mrb[3].mxu1  ;;  %v653_v41 = vmul.f32 %v899_v34, %v646_v36 }
  0xf1   : > { %650 = vst.msk [vmem:[%s359_s8] sm:$0xff] %vm554_vm5, %v648_v33  ;;  %v649_v38 = vmul.f32 %v646_v36, %v622_v37 }
  0xf2   : > { %666 = vst.msk [vmem:[%s367_s11] sm:$0xff] %vm554_vm5, %v664_v35 }
  0xf3   : > { %651 = vst.msk [vmem:[%s359_s8 + $0x8] sm:$0xff] %vm554_vm5, %v649_v38 }
 0x121   : > { %v543_v39 = vpop.permute.xlu1 %542 }
 0x125   : > { %v548_v40 = vpop.permute.xlu1 %547 }
 0x129   : > { %v662_v42 = vpop.permute.xlu1 %661 }
 0x12a   : > { %v665_v43 = vadd.f32 %v662_v42, %v653_v41 }
 0x12c   : > { %667 = vst.msk [vmem:[%s367_s11 + $0x8] sm:$0xff] %vm554_vm5, %v665_v43 }
 0x16a   : > { %v893_v49 = vpop.f32.mrb[0].mxu0 }
 0x16b   : > { %v507_v51 = vmul.f32 2.0, %v893_v49  ;;  %v480_v52 = vpop.f32.mrb[1].mxu0 }
 0x16c   : > { %v506_v53 = vmul.f32 2.0, %v480_v52 }
 0x16d   : > { %v551_v54 = vsub.f32 %v507_v51, %v548_v40 }
 0x16e   : > { %v550_v55 = vsub.f32 %v506_v53, %v543_v39 }
 0x16f   : > { %v553_v56 = vsub.f32 %v551_v54, %v505_v50 }
 0x170   : > { %v552_v57 = vsub.f32 %v550_v55, %v505_v50 }
 0x171   : > { %556 = vst.msk [vmem:[%s350_s13 + $0x8] sm:$0xff] %vm554_vm5, %v553_v56 }
 0x172   : > { %555 = vst.msk [vmem:[%s350_s13] sm:$0xff] %vm554_vm5, %v552_v57 }
 0x173 PF: > { %s18_s26 = sadd.s32 1, %s953_s26   ;;  %s1086_s24 = smov %s949_s25 }
 0x174   : > { %p15_p5 = scmp.ge.s32.totalorder %s18_s26, 4   ;;  %s1087_s25 = smov %s1089_s27 }
 0x176   :  { %17 = sbr.rel (!%p15_p5) target bundleno = 2 (0x2), region = 97 }

// kernel: dgcnn_forward.8
= control target key start
LH: loop header
LB: loop body
LE: loop exit
PB: predicated region body
PF: predicated region fallthrough
CT: control target
= control target key end

     0   :  { %s1093_s24 = smov 0   ;;  %s1095_s25 = smov 0   ;;  %s1208_s0 = inlined_call_operand.vmem [shape: f32[2,16,16], index: 0, kind: input, shape index: {}, may-alias: {0,1}]   ;;  %s1209_s1 = inlined_call_operand.vmem [shape: f32[2,16,16], index: 1, kind: input, shape index: {}, may-alias: {0,1}]   ;;  %s1210_s2 = inlined_call_operand.vmem [shape: bf16[64,16], index: 2, kind: input, shape index: {}]   ;;  %s1211_s3 = inlined_call_operand.vmem [shape: f32[32,1], index: 3, kind: input, shape index: {}]   ;;  %s1212_s4 = inlined_call_operand.vmem [shape: f32[32,1], index: 4, kind: input, shape index: {}]   ;;  %s1213_s5 = inlined_call_operand.vmem [shape: f32[2,16,16], index: 5, kind: output, shape index: {0}]   ;;  %s1214_s6 = inlined_call_operand.vmem [shape: f32[2,32,16], index: 6, kind: output, shape index: {1}]   ;;  %s1215_s7 = inlined_call_operand.vmem [shape: f32[2,32,16], index: 7, kind: output, shape index: {2}]  }
   0x1   :  { %s1097_s26 = smov 0  }
   0x2 LB: > { %s30_s27 = sadd.s32 1, %s1046_s25  ;;  %p936_p0 = scmp.ge.s32.totalorder %s1050_s26, 1  ;;  %s1050_s26 = sphi %s1097_s26, %s18_s26   ;;  %s1046_s25 = sphi %s1095_s25, %s1217_s25   ;;  %s1042_s24 = sphi %s1093_s24, %s1216_s24  }
   0x3   : > { %p32_p1 = scmp.ge.s32.totalorder %s30_s27, 2  ;;  %p275_p2 = scmp.lt.s32.totalorder %s1050_s26, 3 }
   0x5   : > { %s1219_s27 = smov (%p32_p1, %s30_s27), 0  ;;  %p276_p3 = pnand %p936_p0, %p275_p2 }
   0x6   : > { %v671_v0 = vld [vmem:[%s1211_s3] sm:$0xff] (!%p276_p3)  ;;  %p335_p4 = scmp.lt.s32.totalorder (!%p276_p3), %s1042_s24, 1  ;;  %vm411_vm0 = vcmask (!%p276_p3), 130048   ;;  %v1052_v1 = vmov (!%p276_p3), 0   ;;  %v1024_v2 = vld [vmem:[%s1210_s2 + $0x10] sm:$0xff] (!%p276_p3)   ;;  %v672_v3 = vld [vmem:[%s1211_s3 + $0x8] sm:$0xff] (!%p276_p3) }
   0x7   : > { %279 = sbr.rel (%p276_p3) target bundleno = 373 (0x175), region = 40  ;;  %1022 = vset.pattern.permute.xlu1 (!%p276_p3), %v1052_v1  ;;  %986 = vmatprep.mubr.msk.bf16.mxu1 (!%p276_p3), %vm411_vm0, %v1024_v2  ;;  %v673_v7 = vld [vmem:[%s1211_s3 + $0x10] sm:$0xff] (!%p276_p3)  ;;  %v1025_v13 = vld [vmem:[%s1210_s2 + $0x18] sm:$0xff] (!%p276_p3)   ;;  %v676_v29 = vld [vmem:[%s1212_s4 + $0x8] sm:$0xff] (!%p276_p3) }
   0x8   : > { %681 = vperm.xlu1 (!%p276_p3), %1022, %v671_v0   ;;  %v674_v28 = vld [vmem:[%s1211_s3 + $0x18] sm:$0xff] (!%p276_p3)  ;;  %v675_v30 = vld [vmem:[%s1212_s4] sm:$0xff] (!%p276_p3)  ;;  %v1027_v34 = vld [vmem:[%s1210_s2 + $0x8] sm:$0xff] (!%p276_p3)  }
   0x9   : > { %v1026_v32 = vld [vmem:[%s1210_s2] sm:$0xff] (!%p276_p3)   ;;  %v677_v39 = vld [vmem:[%s1212_s4 + $0x10] sm:$0xff] (!%p276_p3)  ;;  %v678_v41 = vld [vmem:[%s1212_s4 + $0x18] sm:$0xff] (!%p276_p3) }
   0xc   : > { %686 = vperm.xlu1 (!%p276_p3), %1022, %v672_v3  }
   0xe   : > { %s1221_s24 = smov (!%p335_p4, %s1042_s24), 1 }
   0xf   : > { %s1124_s11 = sshll.u32 %s1221_s24, 4  ;;  %s962_s18 = sshll.u32 %s1221_s24, 5 }
  0x10   : > { %s342_s14 = scalar_lea.vmem %s1208_s0, %s1124_s11  ;;  %s347_s17 = scalar_lea.vmem %s1209_s1, %s1124_s11  ;;  %691 = vperm.xlu1 %1022, %v673_v7  }
  0x11   : > { %v375_v4 = vld [vmem:[%s342_s14] sm:$0xff]  ;;  %v376_v5 = vld [vmem:[%s342_s14 + $0x8] sm:$0xff]  ;;  %s373_s21 = scalar_lea.vmem %s1215_s7, %s962_s18  ;;  %s356_s28 = scalar_lea.vmem %s1213_s5, %s1124_s11 }
  0x12   : > { %379 = vxpose.xlu0.b32.start [1/2] (short) (narrow) %v375_v4, 16  ;;  %v573_v6 = vpack.c.bf16 %v376_v5, %v375_v4  ;;  %v377_v8 = vld [vmem:[%s347_s17] sm:$0xff]  ;;  %v378_v9 = vld [vmem:[%s347_s17 + $0x8] sm:$0xff]  ;;  %v494_v17 = vmul.f32 %v376_v5, %v376_v5  ;;  %v493_v18 = vmul.f32 %v375_v4, %v375_v4  ;;  %s365_s8 = scalar_lea.vmem %s1214_s6, %s962_s18 }
  0x13   : > { %v990_v10 = vpack.c.bf16 %v378_v9, %v377_v8  ;;  %v504_v11 = vmul.f32 %v377_v8, %v377_v8  ;;  %v505_v12 = vmul.f32 %v378_v9, %v378_v9 }
  0x14   : > { %994 = vmatprep.subr.bf16.mxu1 %v573_v6  ;;  %v496_v19 = vsel %vm411_vm0, %v494_v17, 0.0  ;;  %v495_v20 = vsel %vm411_vm0, %v493_v18, 0.0 }
  0x15   : > { %995 = vmatpush3.bf16.msra.mxu1 %v573_v6  ;;  %v506_v14 = vsel %vm411_vm0, %v504_v11, 0.0  ;;  %v507_v15 = vsel %vm411_vm0, %v505_v12, 0.0  ;;  %991 = vmatprep.subr.bf16.mxu0 %v990_v10  ;;  %v497_v21 = vadd.f32 %v496_v19, %v495_v20 }
  0x16   : > { %380 = vxpose.xlu0.b32.end [2/2] (short) (narrow) %v376_v5, 16  ;;  %v1142_v16 = vadd.f32 %v507_v15, %v506_v14  ;;  %993 = vmatpush3.bf16.msra.mxu0 %v990_v10 }
  0x17   : > { %980 = vmatprep.subr.bf16.mxu0 %v573_v6  ;;  %v498_v22 = vrot.slane %v497_v21, 4 }
  0x18   : > { %987 = vmatmul.mubr.msk.bf16.vlgmr.msra.gmra.mrb[0].mxu1 %vm411_vm0, %v1025_v13  ;;  %v509_v61 = vrot.slane %v1142_v16, 4 }
  0x19   : > { %v499_v23 = vadd.f32 %v498_v22, %v497_v21 }
  0x1a   : > { %v510_v62 = vadd.f32 %v509_v61, %v1142_v16 }
  0x1b   : > { %v500_v24 = vrot.slane %v499_v23, 2 }
  0x1c   : > { %v511_v63 = vrot.slane %v510_v62, 2 }
  0x1d   : > { %v501_v25 = vadd.f32 %v500_v24, %v499_v23 }
  0x1e   : > { %v512_v0 = vadd.f32 %v511_v63, %v510_v62 }
  0x1f   : > { %v502_v26 = vrot.slane %v501_v25, 1 }
  0x21   : > { %v503_v27 = vadd.f32 %v502_v26, %v501_v25 }
  0x39   : > { %517 = vxpose.xlu1.b32.start.end [1/1] (short) (narrow) %v503_v27, 16 }
  0x3f   : > { %1023 = vset.pattern.permute.xlu0 %v1052_v1  ;;  %v513_v1 = vrot.slane %v512_v0, 1 }
  0x40   : > { %696 = vperm.xlu0 %1023, %v674_v28  }
  0x41   : > { %v514_v3 = vadd.f32 %v513_v1, %v512_v0 }
  0x44   : > { %718 = vperm.xlu0 %1023, %v676_v29  }
  0x5b   : > { %713 = vperm.xlu1 %1022, %v675_v30  }
  0x87   : > { %v682_v35 = vpop.permute.xlu1 %681 }
  0x8b   : > { %v687_v36 = vpop.permute.xlu1 %686 }
  0x8f   : > { %v692_v37 = vpop.permute.xlu1 %691 }
  0x92   : > { %v395_v31 = vpop.trf.xlu0 }
  0x93   : > { %977 = vmatprep.mubr.msk.f32.mxu0 %vm411_vm0, %v395_v31 }
  0x96   : > { %v396_v33 = vpop.trf.xlu0 }
  0x97   : > { %978 = vmatmul.mubr.msk.f32.vlgmr.msra.gmra.mrb[0].mxu0 %vm411_vm0, %v396_v33 }
  0x98   : > { %981 = vmatpush3.bf16.msra.mxu0 %v573_v6  ;;  %982 = vmatprep.mubr.msk.bf16.mxu0 %vm411_vm0, %v1026_v32 }
  0x9b   : > { %983 = vmatmul.mubr.msk.bf16.vlgmr.msra.gmra.mrb[4].mxu0 %vm411_vm0, %v1027_v34 }
  0xb9   : > { %v533_v38 = vpop.trf.xlu1 }
  0xba   : > { %551 = vperm.xlu1 %1022, %v533_v38  }
  0xbd   : > { %v534_v40 = vpop.trf.xlu1 }
  0xbe   : > { %723 = vperm.xlu1 %1022, %v677_v39   ;;  %556 = vperm.xlu0 %1023, %v534_v40  }
  0xbf   : > { %v697_v42 = vpop.permute.xlu0 %696 }
  0xc2   : > { %728 = vperm.xlu0 %1023, %v678_v41  }
  0xc3   : > { %v719_v47 = vpop.permute.xlu0 %718 }
  0xda   : > { %v714_v48 = vpop.permute.xlu1 %713 }
  0xeb   : > { %v988_v43 = vpop.f32.mrb[0].mxu1 }
  0xec   : > { %v656_v44 = vpop.f32.mrb[1].mxu1  ;;  %v709_v54 = vmul.f32 %v988_v43, %v692_v37 }
  0xed   : > { %v707_v45 = vmul.f32 %v682_v35, %v656_v44  ;;  %v989_v46 = vpop.f32.mrb[2].mxu1 }
  0xee   : > { %v659_v49 = vpop.f32.mrb[3].mxu1  ;;  %v710_v57 = vmul.f32 %v989_v46, %v697_v42 }
  0xef   : > { %v731_v50 = vadd.f32 %v714_v48, %v707_v45  ;;  %v708_v51 = vmul.f32 %v687_v36, %v659_v49 }
  0xf1   : > { %735 = vst.msk [vmem:[%s373_s21] sm:$0xff] %vm411_vm0, %v731_v50  ;;  %v732_v52 = vadd.f32 %v719_v47, %v708_v51 }
  0xf3   : > { %736 = vst.msk [vmem:[%s373_s21 + $0x8] sm:$0xff] %vm411_vm0, %v732_v52 }
 0x139   : > { %v552_v53 = vpop.permute.xlu1 %551 }
 0x13d   : > { %v724_v55 = vpop.permute.xlu1 %723  ;;  %v557_v56 = vpop.permute.xlu0 %556 }
 0x13e   : > { %v733_v58 = vadd.f32 %v724_v55, %v709_v54 }
 0x140   : > { %737 = vst.msk [vmem:[%s373_s21 + $0x10] sm:$0xff] %vm411_vm0, %v733_v58 }
 0x141   : > { %v729_v59 = vpop.permute.xlu0 %728 }
 0x142   : > { %v734_v60 = vadd.f32 %v729_v59, %v710_v57 }
 0x144   : > { %738 = vst.msk [vmem:[%s373_s21 + $0x18] sm:$0xff] %vm411_vm0, %v734_v60 }
 0x16a   : > { %v979_v2 = vpop.f32.mrb[0].mxu0 }
 0x16b   : > { %v516_v4 = vmul.f32 2.0, %v979_v2  ;;  %v484_v5 = vpop.f32.mrb[1].mxu0 }
 0x16c   : > { %v515_v6 = vmul.f32 2.0, %v484_v5 }
 0x16d   : > { %v560_v7 = vsub.f32 %v516_v4, %v557_v56 }
 0x16e   : > { %v559_v8 = vsub.f32 %v515_v6, %v552_v53  ;;  %v984_v9 = vpop.f32.mrb[4].mxu0 }
 0x16f   : > { %v562_v10 = vsub.f32 %v560_v7, %v514_v3  ;;  %v701_v11 = vmul.f32 %v984_v9, %v692_v37  ;;  %v640_v12 = vpop.f32.mrb[5].mxu0 }
 0x170   : > { %v561_v13 = vsub.f32 %v559_v8, %v514_v3  ;;  %v699_v14 = vmul.f32 %v682_v35, %v640_v12  ;;  %v985_v15 = vpop.f32.mrb[6].mxu0 }
 0x171   : > { %564 = vst.msk [vmem:[%s356_s28 + $0x8] sm:$0xff] %vm411_vm0, %v562_v10  ;;  %705 = vst.msk [vmem:[%s365_s8 + $0x10] sm:$0xff] %vm411_vm0, %v701_v11  ;;  %v702_v16 = vmul.f32 %v985_v15, %v697_v42  ;;  %v643_v17 = vpop.f32.mrb[7].mxu0 }
 0x172   : > { %563 = vst.msk [vmem:[%s356_s28] sm:$0xff] %vm411_vm0, %v561_v13  ;;  %703 = vst.msk [vmem:[%s365_s8] sm:$0xff] %vm411_vm0, %v699_v14  ;;  %v700_v18 = vmul.f32 %v687_v36, %v643_v17 }
 0x173   : > { %706 = vst.msk [vmem:[%s365_s8 + $0x18] sm:$0xff] %vm411_vm0, %v702_v16 }
 0x174   : > { %704 = vst.msk [vmem:[%s365_s8 + $0x8] sm:$0xff] %vm411_vm0, %v700_v18 }
 0x175 PF: > { %s18_s26 = sadd.s32 1, %s1050_s26   ;;  %s1216_s24 = smov %s1046_s25 }
 0x176   : > { %p15_p5 = scmp.ge.s32.totalorder %s18_s26, 4   ;;  %s1217_s25 = smov %s1219_s27 }
 0x178   :  { %17 = sbr.rel (!%p15_p5) target bundleno = 2 (0x2), region = 97 }

// kernel: dgcnn_forward.9
= control target key start
LH: loop header
LB: loop body
LE: loop exit
PB: predicated region body
PF: predicated region fallthrough
CT: control target
= control target key end

     0   :  { %s440_s9 = smov 0   ;;  %s442_s10 = smov 0   ;;  %s514_s0 = inlined_call_operand.vmem [shape: f32[2,4,32,16], index: 0, kind: input, shape index: {}]   ;;  %s515_s1 = inlined_call_operand.vmem [shape: f32[2,32,16], index: 1, kind: input, shape index: {}]   ;;  %s516_s2 = inlined_call_operand.vmem [shape: f32[2,32,16], index: 2, kind: output, shape index: {}]  }
   0x1   :  { %s444_s11 = smov 0   ;;  %s446_s12 = smov 0  }
   0x2   :  { %s448_s13 = smov 0  }
   0x3 LB: > { %s21_s14 = sadd.s32 1, %s415_s11  ;;  %s24_s15 = sadd.s32 1, %s419_s12  ;;  %s423_s13 = sphi %s448_s13, %s12_s13   ;;  %s419_s12 = sphi %s446_s12, %s520_s12   ;;  %s415_s11 = sphi %s444_s11, %s519_s11   ;;  %s411_s10 = sphi %s442_s10, %s518_s10   ;;  %s407_s9 = sphi %s440_s9, %s517_s9  }
   0x4   : > { %p22_p0 = scmp.ge.s32.totalorder %s21_s14, 4  ;;  %p331_p1 = scmp.ge.s32.totalorder %s423_s13, 1 }
   0x5   : > { %p140_p2 = scmp.lt.s32.totalorder %s423_s13, 9 }
   0x6   : > { %s522_s14 = smov (%p22_p0, %s21_s14), 0  ;;  %s524_s15 = smov (!%p22_p0, %s24_s15), %s419_s12 }
   0x7   : > { %p141_p3 = pnand %p331_p1, %p140_p2  ;;  %p26_p4 = scmp.ge.s32.totalorder %s524_s15, 2 }
   0x8   : > { %p171_p5 = scmp.lt.s32.totalorder (!%p141_p3), %s411_s10, 1  ;;  %p173_p6 = scmp.lt.s32.totalorder (!%p141_p3), %s407_s9, 3 }
   0x9   : > { %s526_s15 = smov (%p26_p4, %s524_s15), 0  ;;  %144 = sbr.rel (%p141_p3) target bundleno = 43 (0x2b), region = 28 }
   0xa   : > { %p339_p7 = scmp.ne.s32.totalorder (!%p141_p3), %s407_s9, 0 }
  0x10   : > { %s528_s10 = smov (!%p171_p5, %s411_s10), 1  ;;  %vm218_vm4 = vcmask (!%p339_p7), 130048  }
  0x11   : > { %s174_s16 = scalar_select %p173_p6, %s407_s9, 3 }
  0x12   : > { %s333_s17 = sshll.u32 %s528_s10, 4  ;;  %s343_s18 = sshll.u32 %s528_s10, 5 }
  0x13   : > { %s332_s19 = sshll.u32 %s174_s16, 2  ;;  %s184_s22 = scalar_lea.vmem %s515_s1, %s343_s18 }
  0x14   : > { %s177_s23 = sadd.s32 %s333_s17, %s332_s19  ;;  %s480_s26 = scalar_lea.vmem %s516_s2, %s343_s18  ;;  %v194_v0 = vld [vmem:[%s184_s22] sm:$0xff]  ;;  %v195_v1 = vld [vmem:[%s184_s22 + $0x8] sm:$0xff]  ;;  %v196_v2 = vld [vmem:[%s184_s22 + $0x10] sm:$0xff] }
  0x15   : > { %s334_s27 = sshll.u32 %s177_s23, 3  ;;  %v197_v3 = vld [vmem:[%s184_s22 + $0x18] sm:$0xff] }
  0x16   : > { %s179_s30 = scalar_lea.vmem %s514_s0, %s334_s27 }
  0x17   : > { %v190_v4 = vld [vmem:[%s179_s30] sm:$0xff]  ;;  %v191_v5 = vld [vmem:[%s179_s30 + $0x8] sm:$0xff]  ;;  %v192_v6 = vld [vmem:[%s179_s30 + $0x10] sm:$0xff] }
  0x18   : > { %v193_v7 = vld [vmem:[%s179_s30 + $0x18] sm:$0xff]  ;;  %v198_v8 = vadd.f32 %v194_v0, %v190_v4  ;;  %v199_v9 = vadd.f32 %v195_v1, %v191_v5  ;;  %v200_v10 = vadd.f32 %v196_v2, %v192_v6  ;;  %217 = sbr.rel (%p339_p7) target bundleno = 32 (0x20), region = 32 }
  0x19   : > { %v201_v11 = vadd.f32 %v197_v3, %v193_v7 }
  0x1a   : > { %vm202_vm0 = vcmp.gt.f32.partialorder %v198_v8, 0.0  ;;  %vm203_vm1 = vcmp.gt.f32.partialorder %v199_v9, 0.0  ;;  %vm204_vm2 = vcmp.gt.f32.partialorder %v200_v10, 0.0  ;;  %v206_v12 = vmul.f32 0.2, %v198_v8 }
  0x1b   : > { %vm205_vm3 = vcmp.gt.f32.partialorder %v201_v11, 0.0  ;;  %v207_v13 = vmul.f32 0.2, %v199_v9  ;;  %v208_v14 = vmul.f32 0.2, %v200_v10 }
  0x1c   : > { %v209_v15 = vmul.f32 0.2, %v201_v11  ;;  %v210_v16 = vsel %vm202_vm0, %v198_v8, %v206_v12 }
  0x1d   : > { %v211_v17 = vsel %vm203_vm1, %v199_v9, %v207_v13  ;;  %v212_v18 = vsel %vm204_vm2, %v200_v10, %v208_v14  ;;  %219 = vst.msk [vmem:[%s480_s26] sm:$0xff] (!%p339_p7), %vm218_vm4, %v210_v16 }
  0x1e   : > { %v213_v19 = vsel %vm205_vm3, %v201_v11, %v209_v15  ;;  %220 = vst.msk [vmem:[%s480_s26 + $0x8] sm:$0xff] (!%p339_p7), %vm218_vm4, %v211_v17  ;;  %221 = vst.msk [vmem:[%s480_s26 + $0x10] sm:$0xff] (!%p339_p7), %vm218_vm4, %v212_v18 }
  0x1f   : > { %222 = vst.msk [vmem:[%s480_s26 + $0x18] sm:$0xff] %vm218_vm4, %v213_v19 }
  0x20 PF: > { %p340_p8 = scmp.le.s32.totalorder %s407_s9, 0 }
  0x21   : > { %vm235_vm5 = vcmask (!%p340_p8), 130048  }
  0x22   : > { %226 = sbr.rel (%p340_p8) target bundleno = 43 (0x2b), region = 36 }
  0x25   : > { %v227_v20 = vld [vmem:[%s480_s26] sm:$0xff] (!%p340_p8) }
  0x26   : > { %v228_v21 = vld [vmem:[%s480_s26 + $0x8] sm:$0xff] (!%p340_p8)  ;;  %v229_v22 = vld [vmem:[%s480_s26 + $0x10] sm:$0xff] (!%p340_p8)  ;;  %v231_v23 = vmax.f32 (!%p340_p8), %v227_v20, %v210_v16  ;;  %v230_v26 = vld [vmem:[%s480_s26 + $0x18] sm:$0xff] (!%p340_p8) }
  0x27   : > { %v232_v24 = vmax.f32 (!%p340_p8), %v228_v21, %v211_v17  ;;  %v233_v25 = vmax.f32 (!%p340_p8), %v229_v22, %v212_v18  ;;  %v234_v27 = vmax.f32 (!%p340_p8), %v230_v26, %v213_v19 }
  0x28   : > { %236 = vst.msk [vmem:[%s480_s26] sm:$0xff] (!%p340_p8), %vm235_vm5, %v231_v23 }
  0x29   : > { %237 = vst.msk [vmem:[%s480_s26 + $0x8] sm:$0xff] %vm235_vm5, %v232_v24  ;;  %238 = vst.msk [vmem:[%s480_s26 + $0x10] sm:$0xff] %vm235_vm5, %v233_v25 }
  0x2a   : > { %239 = vst.msk [vmem:[%s480_s26 + $0x18] sm:$0xff] %vm235_vm5, %v234_v27 }
  0x2b PF: > { %s12_s13 = sadd.s32 1, %s423_s13   ;;  %s517_s9 = smov %s415_s11 }
  0x2c   : > { %p9_p9 = scmp.ge.s32.totalorder %s12_s13, 10   ;;  %s518_s10 = smov %s419_s12 }
  0x2d   : > { %s519_s11 = smov %s522_s14  ;;  %s520_s12 = smov %s526_s15 }
  0x2e   :  { %11 = sbr.rel (!%p9_p9) target bundleno = 3 (0x3), region = 69 }

// kernel: dgcnn_forward.10
= control target key start
LH: loop header
LB: loop body
LE: loop exit
PB: predicated region body
PF: predicated region fallthrough
CT: control target
= control target key end

     0   :  { %s468_s15 = smov 0   ;;  %s509_s0 = inlined_call_operand.vmem [shape: f32[2,48,16], index: 0, kind: input, shape index: {}]   ;;  %s510_s1 = inlined_call_operand.vmem [shape: bf16[48,32], index: 1, kind: input, shape index: {}]   ;;  %s511_s2 = inlined_call_operand.vmem [shape: f32[1,32], index: 2, kind: input, shape index: {}]   ;;  %s512_s3 = inlined_call_operand.vmem [shape: f32[1,32], index: 3, kind: input, shape index: {}]   ;;  %s513_s4 = inlined_call_operand.vmem [shape: f32[2,1,64], index: 4, kind: output, shape index: {}]  }
   0x1 LB: > { %s388_s16 = sadd.s32 4294967295, %s438_s15   ;;  %p392_p0 = scmp.ge.s32.totalorder %s438_s15, 1  ;;  %s438_s15 = sphi %s468_s15, %s14_s15  }
   0x2   : > { %p162_p1 = scmp.lt.s32.totalorder %s438_s15, 3 }
   0x4   : > { %p163_p2 = pnand %p392_p0, %p162_p1 }
   0x5   : > { %p186_p3 = scmp.lt.s32.totalorder (!%p163_p2), %s388_s16, 1  ;;  %v429_v0 = vld [vmem:[%s510_s1] sm:$0xff] (!%p163_p2)   ;;  %v440_v1 = vmov (!%p163_p2), 0.0   ;;  %v430_v2 = vld [vmem:[%s510_s1 + $0x8] sm:$0xff] (!%p163_p2)   ;;  %vm441_vm0 = vmmov (!%p163_p2), 0   ;;  %v431_v3 = vld [vmem:[%s510_s1 + $0x10] sm:$0xff] (!%p163_p2)  }
   0x6   : > { %166 = sbr.rel (%p163_p2) target bundleno = 478 (0x1de), region = 36  ;;  %406 = vmatprep.subr.bf16.mxu0 (!%p163_p2), %v440_v1  ;;  %412 = vmatprep.mubr.msk.bf16.mxu0 (!%p163_p2), %vm441_vm0, %v440_v1  ;;  %vm244_vm1 = vcmask (!%p163_p2), 392192   ;;  %v398_v14 = vld [vmem:[%s511_s2] ss:$0 sm:$0xff] (!%p163_p2)  ;;  %vm313_vm3 = vcmask (!%p163_p2), 261120   ;;  %s442_s5 = smov (!%p163_p2), 32  }
   0x7   : > { %407 = vmatpush3.bf16.msra.mxu0 (!%p163_p2), %v429_v0  ;;  %v399_v16 = vld [vmem:[%s512_s3] ss:$0 sm:$0xff] (!%p163_p2)  ;;  %vm339_vm5 = vcmask (!%p163_p2), 516096  }
   0x8   : > { %408 = vmatprep.subr.bf16.mxu0 (!%p163_p2), %v440_v1 }
   0xb   : > { %409 = vmatpush3.bf16.msra.mxu0 (!%p163_p2), %v430_v2 }
   0xc   : > { %410 = vmatprep.subr.bf16.mxu0 (!%p163_p2), %v440_v1 }
   0xd   : > { %s515_s16 = smov (!%p186_p3, %s388_s16), 1 }
   0xe   : > { %s416_s21 = smul.u32 48, %s515_s16  ;;  %s193_s8 = scalar_lea.vmem %s513_s4, %s515_s16 }
   0xf   : > { %411 = vmatpush3.bf16.msra.mxu0 %v431_v3 }
  0x10   : > { %s190_s24 = scalar_lea.vmem %s509_s0, %s416_s21 }
  0x11   : > { %v195_v4 = vld [vmem:[%s190_s24] sm:$0xff]  ;;  %v196_v5 = vld [vmem:[%s190_s24 + $0x8] sm:$0xff]  ;;  %v197_v6 = vld [vmem:[%s190_s24 + $0x10] sm:$0xff] }
  0x12   : > { %v201_v7 = vpack.c.bf16 %v196_v5, %v195_v4  ;;  %v198_v8 = vld [vmem:[%s190_s24 + $0x18] sm:$0xff]  ;;  %v199_v10 = vld [vmem:[%s190_s24 + $0x20] sm:$0xff]  ;;  %v200_v11 = vld [vmem:[%s190_s24 + $0x28] sm:$0xff] }
  0x13   : > { %v202_v9 = vpack.c.bf16 %v198_v8, %v197_v6  ;;  %v203_v12 = vpack.c.bf16 %v200_v11, %v199_v10 }
  0x14   : > { %210 = vxpose.xlu0.c.b16.start [1/3] (short) (narrow) %v201_v7, 16 }
  0x18   : > { %211 = vxpose.xlu0.c.b16.cont [2/3] (short) (narrow) %v202_v9, 16 }
  0x1c   : > { %212 = vxpose.xlu0.c.b16.end [3/3] (short) (narrow) %v203_v12, 16 }
  0x7a   : > { %v218_v13 = vpop.trf.xlu0 }
  0x7b   : > { %413 = vmatmul.mubr.msk.bf16.vlgmr.msra.gmra.mrb[0].mxu0 %vm244_vm1, %v218_v13 }
 0x14e   : > { %v282_v15 = vpop.f32.mrb[0].mxu0 }
 0x14f   : > { %v296_v17 = vmul.f32 %v398_v14, %v282_v15  ;;  %v414_v18 = vpop.f32.mrb[1].mxu0 }
 0x150   : > { %v285_v19 = vpop.f32.mrb[2].mxu0 }
 0x151   : > { %v305_v20 = vadd.f32 %v399_v16, %v296_v17  ;;  %v297_v21 = vmul.f32 %v398_v14, %v285_v19  ;;  %v415_v22 = vpop.f32.mrb[3].mxu0 }
 0x153   : > { %vm307_vm2 = vcmp.gt.f32.partialorder %v305_v20, 0.0  ;;  %v309_v23 = vmul.f32 0.2, %v305_v20  ;;  %v306_v24 = vadd.f32 %v399_v16, %v297_v21 }
 0x155   : > { %v311_v25 = vsel %vm307_vm2, %v305_v20, %v309_v23  ;;  %vm308_vm4 = vcmp.gt.f32.partialorder %v306_v24, 0.0  ;;  %v310_v26 = vmul.f32 0.2, %v306_v24 }
 0x156   : > { %v314_v28 = vsel %vm313_vm3, %v311_v25, -inf  ;;  %v323_v29 = vsel %vm313_vm3, %v311_v25, 0.0 }
 0x157   : > { %v312_v27 = vsel %vm308_vm4, %v306_v24, %v310_v26 }
 0x158   : > { %v315_v30 = vsel %vm313_vm3, %v312_v27, -inf  ;;  %v324_v31 = vsel %vm313_vm3, %v312_v27, 0.0 }
 0x159   : > { %v316_v32 = vmax.f32 %v314_v28, %v315_v30  ;;  %v325_v33 = vadd.f32 %v324_v31, %v323_v29 }
 0x15b   : > { %v326_v34 = vrot.slane %v325_v33, 4  ;;  %v317_v41 = vrot.slane %v316_v32, 4 }
 0x15d   : > { %v327_v35 = vadd.f32 %v326_v34, %v325_v33  ;;  %v318_v42 = vmax.f32 %v316_v32, %v317_v41 }
 0x15f   : > { %v328_v36 = vrot.slane %v327_v35, 2  ;;  %v319_v43 = vrot.slane %v318_v42, 2 }
 0x161   : > { %v329_v37 = vadd.f32 %v328_v36, %v327_v35  ;;  %v320_v44 = vmax.f32 %v318_v42, %v319_v43 }
 0x163   : > { %v330_v38 = vrot.slane %v329_v37, 1  ;;  %v321_v45 = vrot.slane %v320_v44, 1 }
 0x165   : > { %v331_v39 = vadd.f32 %v330_v38, %v329_v37  ;;  %v322_v46 = vmax.f32 %v320_v44, %v321_v45 }
 0x167   : > { %v333_v40 = vmul.f32 0.0625, %v331_v39 }
 0x169   : > { %335 = vrot.lane.b32.xlu1 %v333_v40, %s442_s5 }
 0x1db   : > { %v336_v47 = vpop.permute.xlu1 %335 }
 0x1dc   : > { %v338_v48 = vsel %vm313_vm3, %v322_v46, %v336_v47 }
 0x1dd   : > { %340 = vst.msk [vmem:[%s193_s8] sm:$0x1] %vm339_vm5, %v338_v48 }
 0x1de PF: > { %s14_s15 = sadd.s32 1, %s438_s15  }
 0x1df   : > { %p11_p4 = scmp.ge.s32.totalorder %s14_s15, 4  }
 0x1e1   :  { %13 = sbr.rel (!%p11_p4) target bundleno = 1 (0x1), region = 66 }

// kernel: dgcnn_forward.11
= control target key start
LH: loop header
LB: loop body
LE: loop exit
PB: predicated region body
PF: predicated region fallthrough
CT: control target
= control target key end

     0   :  { %v1281_v2 = vmov 0   ;;  %vm135_vm0 = vcmask 523264   ;;  %s1675_s0 = inlined_call_operand.vmem [shape: f32[2,64], index: 0, kind: input, shape index: {}]   ;;  %s1676_s1 = inlined_call_operand.vmem [shape: bf16[64,512], index: 1, kind: input, shape index: {}]   ;;  %s1677_s2 = inlined_call_operand.vmem [shape: f32[1,512], index: 2, kind: input, shape index: {}]   ;;  %s1678_s3 = inlined_call_operand.vmem [shape: f32[1,512], index: 3, kind: input, shape index: {}]   ;;  %s1679_s4 = inlined_call_operand.vmem [shape: bf16[512,256], index: 4, kind: input, shape index: {}]   ;;  %s1680_s5 = inlined_call_operand.vmem [shape: f32[1,256], index: 5, kind: input, shape index: {}]   ;;  %s1681_s6 = inlined_call_operand.vmem [shape: f32[1,256], index: 6, kind: input, shape index: {}]   ;;  %s1682_s7 = inlined_call_operand.vmem [shape: f32[1,256], index: 7, kind: input, shape index: {}]   ;;  %s1683_s8 = inlined_call_operand.vmem [shape: bf16[256,3], index: 8, kind: input, shape index: {}]   ;;  %s1684_s9 = inlined_call_operand.vmem [shape: f32[1,3], index: 9, kind: input, shape index: {}]   ;;  %s1685_s10 = inlined_call_operand.hbm [shape: f32[2,3], index: 10, kind: output, shape index: {}]  }
   0x1   :  { %v1121_v0 = vld [vmem:[%s1676_s1 + $0x4] ss:$16 sps:$4 sm:$0xff]   ;;  %v1123_v1 = vld [vmem:[%s1676_s1] ss:$16 sps:$4 sm:$0xff]   ;;  %171 = vmatprep.mubr.bf16.mxu0 %v1281_v2  ;;  %v1135_v10 = vld [vmem:[%s1676_s1 + $0xc] ss:$16 sps:$4 sm:$0xff]  }
   0x2   :  { %139 = vmatprep.subr.bf16.mxu0 %v1121_v0  ;;  %v1124_v3 = vld [vmem:[%s1676_s1 + $0x24] ss:$16 sps:$4 sm:$0xff]   ;;  %v1126_v4 = vld [vmem:[%s1676_s1 + $0x20] ss:$16 sps:$4 sm:$0xff]   ;;  %v1133_v15 = vld [vmem:[%s1676_s1 + $0x8] ss:$16 sps:$4 sm:$0xff]  }
   0x3   :  { %140 = vmatpush1.bf16.msra.mxu0 %v1123_v1  ;;  %v1127_v5 = vld [vmem:[%s1676_s1 + $0x44] ss:$16 sps:$4 sm:$0xff]   ;;  %v1129_v6 = vld [vmem:[%s1676_s1 + $0x40] ss:$16 sps:$4 sm:$0xff]   ;;  %v1138_v17 = vld [vmem:[%s1676_s1 + $0x2c] ss:$16 sps:$4 sm:$0xff]  }
   0x4   :  { %141 = vmatprep.subr.bf16.mxu0 %v1124_v3  ;;  %v1130_v7 = vld [vmem:[%s1676_s1 + $0x64] ss:$16 sps:$4 sm:$0xff]   ;;  %v1132_v8 = vld [vmem:[%s1676_s1 + $0x60] ss:$16 sps:$4 sm:$0xff]   ;;  %v1136_v19 = vld [vmem:[%s1676_s1 + $0x28] ss:$16 sps:$4 sm:$0xff]  }
   0x5   :  { %v37_v9 = vld [vmem:[%s1675_s0] sm:$0x3]  ;;  %v1145_v11 = vld [vmem:[%s1679_s4 + $0x4] ss:$8 sps:$4 sm:$0xff]   ;;  %v1148_v13 = vld [vmem:[%s1679_s4 + $0x14] ss:$8 sps:$4 sm:$0xff]  }
   0x6   :  { %v1147_v12 = vld [vmem:[%s1679_s4] ss:$8 sps:$4 sm:$0xff]   ;;  %685 = vmatprep.subr.bf16.mxu1 %v1145_v11  ;;  %v38_v14 = vpack.c.bf16 %v37_v9, %v37_v9  ;;  %v1150_v16 = vld [vmem:[%s1679_s4 + $0x10] ss:$8 sps:$4 sm:$0xff]   ;;  %v1151_v18 = vld [vmem:[%s1679_s4 + $0x24] ss:$8 sps:$4 sm:$0xff]  }
   0x7   :  { %142 = vmatpush1.bf16.msra.mxu0 %v1126_v4  ;;  %686 = vmatpush1.bf16.msra.mxu1 %v1147_v12  ;;  %v1153_v20 = vld [vmem:[%s1679_s4 + $0x20] ss:$8 sps:$4 sm:$0xff]   ;;  %v1154_v21 = vld [vmem:[%s1679_s4 + $0x34] ss:$8 sps:$4 sm:$0xff]   ;;  %v1156_v23 = vld [vmem:[%s1679_s4 + $0x30] ss:$8 sps:$4 sm:$0xff]  }
   0x8   :  { %143 = vmatprep.subr.bf16.mxu0 %v1127_v5  ;;  %687 = vmatprep.subr.bf16.mxu1 %v1148_v13  ;;  %v1141_v22 = vld [vmem:[%s1676_s1 + $0x4c] ss:$16 sps:$4 sm:$0xff]   ;;  %v1139_v24 = vld [vmem:[%s1676_s1 + $0x48] ss:$16 sps:$4 sm:$0xff]  }
   0x9   :  { %v1157_v25 = vld [vmem:[%s1679_s4 + $0x44] ss:$8 sps:$4 sm:$0xff]   ;;  %v1142_v27 = vld [vmem:[%s1676_s1 + $0x68] ss:$16 sps:$4 sm:$0xff]   ;;  %v1163_v29 = vld [vmem:[%s1679_s4 + $0x54] ss:$8 sps:$4 sm:$0xff]  }
   0xa   :  { %v1144_v26 = vld [vmem:[%s1676_s1 + $0x6c] ss:$16 sps:$4 sm:$0xff]   ;;  %v1162_v28 = vld [vmem:[%s1679_s4 + $0x40] ss:$8 sps:$4 sm:$0xff]   ;;  %v1168_v31 = vld [vmem:[%s1679_s4 + $0x50] ss:$8 sps:$4 sm:$0xff]  }
   0xb   :  { %144 = vmatpush1.bf16.msra.mxu0 %v1129_v6  ;;  %688 = vmatpush1.bf16.msra.mxu1 %v1150_v16  ;;  %v1161_v30 = vld [vmem:[%s1679_s4 + $0x104] ss:$8 sps:$4 sm:$0xff]   ;;  %v1159_v32 = vld [vmem:[%s1679_s4 + $0x100] ss:$8 sps:$4 sm:$0xff]   ;;  %v1167_v34 = vld [vmem:[%s1679_s4 + $0x114] ss:$8 sps:$4 sm:$0xff]  }
   0xc   :  { %145 = vmatprep.subr.bf16.mxu0 %v1130_v7  ;;  %689 = vmatprep.subr.bf16.mxu1 %v1151_v18  ;;  %v1169_v33 = vld [vmem:[%s1679_s4 + $0x64] ss:$8 sps:$4 sm:$0xff]   ;;  %v1165_v35 = vld [vmem:[%s1679_s4 + $0x110] ss:$8 sps:$4 sm:$0xff]   ;;  %v1174_v36 = vld [vmem:[%s1679_s4 + $0x60] ss:$8 sps:$4 sm:$0xff]  }
   0xd   :  { %v1175_v37 = vld [vmem:[%s1679_s4 + $0x74] ss:$8 sps:$4 sm:$0xff]   ;;  %v1173_v38 = vld [vmem:[%s1679_s4 + $0x124] ss:$8 sps:$4 sm:$0xff]   ;;  %v1171_v39 = vld [vmem:[%s1679_s4 + $0x120] ss:$8 sps:$4 sm:$0xff]  }
   0xe   :  { %v1180_v40 = vld [vmem:[%s1679_s4 + $0x70] ss:$8 sps:$4 sm:$0xff]   ;;  %v1179_v41 = vld [vmem:[%s1679_s4 + $0x134] ss:$8 sps:$4 sm:$0xff]   ;;  %v1181_v42 = vld [vmem:[%s1679_s4 + $0x84] ss:$8 sps:$4 sm:$0xff]  }
   0xf   :  { %146 = vmatpush1.bf16.msra.mxu0 %v1132_v8  ;;  %690 = vmatpush1.bf16.msra.mxu1 %v1153_v20  ;;  %v1186_v43 = vld [vmem:[%s1679_s4 + $0x80] ss:$8 sps:$4 sm:$0xff]   ;;  %v1177_v44 = vld [vmem:[%s1679_s4 + $0x130] ss:$8 sps:$4 sm:$0xff]   ;;  %v1187_v45 = vld [vmem:[%s1679_s4 + $0x94] ss:$8 sps:$4 sm:$0xff]  }
  0x10   :  { %180 = vmatprep.subr.bf16.mxu0 %v1135_v10  ;;  %691 = vmatprep.subr.bf16.mxu1 %v1154_v21  ;;  %v1185_v46 = vld [vmem:[%s1679_s4 + $0x144] ss:$8 sps:$4 sm:$0xff]   ;;  %v1192_v47 = vld [vmem:[%s1679_s4 + $0x90] ss:$8 sps:$4 sm:$0xff]   ;;  %v1183_v48 = vld [vmem:[%s1679_s4 + $0x140] ss:$8 sps:$4 sm:$0xff]  }
  0x11   :  { %v1193_v49 = vld [vmem:[%s1679_s4 + $0xa4] ss:$8 sps:$4 sm:$0xff]   ;;  %v1191_v50 = vld [vmem:[%s1679_s4 + $0x154] ss:$8 sps:$4 sm:$0xff]   ;;  %v1198_v51 = vld [vmem:[%s1679_s4 + $0xa0] ss:$8 sps:$4 sm:$0xff]  }
  0x12   :  { %1010 = vmatmul.mubr.msk.bf16.vlgmr.msra.gmra.mrb[0].mxu0 %vm135_vm0, %v38_v14  ;;  %v1189_v52 = vld [vmem:[%s1679_s4 + $0x150] ss:$8 sps:$4 sm:$0xff]   ;;  %v1199_v53 = vld [vmem:[%s1679_s4 + $0xb4] ss:$8 sps:$4 sm:$0xff]   ;;  %v1197_v54 = vld [vmem:[%s1679_s4 + $0x164] ss:$8 sps:$4 sm:$0xff]  }
  0x13   :  { %181 = vmatpush1.bf16.msra.mxu0 %v1133_v15  ;;  %212 = vmatprep.mubr.bf16.mxu0 %v1281_v2  ;;  %v1204_v55 = vld [vmem:[%s1679_s4 + $0xb0] ss:$8 sps:$4 sm:$0xff]   ;;  %v1195_v56 = vld [vmem:[%s1679_s4 + $0x160] ss:$8 sps:$4 sm:$0xff]   ;;  %v1205_v57 = vld [vmem:[%s1679_s4 + $0xc4] ss:$8 sps:$4 sm:$0xff]  }
  0x14   :  { %182 = vmatprep.subr.bf16.mxu0 %v1138_v17  ;;  %692 = vmatpush1.bf16.msra.mxu1 %v1156_v23  ;;  %v1203_v58 = vld [vmem:[%s1679_s4 + $0x174] ss:$8 sps:$4 sm:$0xff]  }
  0x15   :  { %693 = vmatprep.subr.bf16.mxu1 %v1157_v25 }
  0x17   :  { %183 = vmatpush1.bf16.msra.mxu0 %v1136_v19 }
  0x18   :  { %184 = vmatprep.subr.bf16.mxu0 %v1141_v22  ;;  %694 = vmatpush1.bf16.msra.mxu1 %v1162_v28 }
  0x19   :  { %695 = vmatprep.subr.bf16.mxu1 %v1163_v29 }
  0x1b   :  { %185 = vmatpush1.bf16.msra.mxu0 %v1139_v24 }
  0x1c   :  { %186 = vmatprep.subr.bf16.mxu0 %v1144_v26  ;;  %696 = vmatpush1.bf16.msra.mxu1 %v1168_v31 }
  0x1d   :  { %697 = vmatprep.subr.bf16.mxu1 %v1169_v33 }
  0x1f   :  { %187 = vmatpush1.bf16.msra.mxu0 %v1142_v27 }
  0x20   :  { %726 = vmatprep.subr.bf16.mxu0 %v1161_v30  ;;  %698 = vmatpush1.bf16.msra.mxu1 %v1174_v36 }
  0x21   :  { %699 = vmatprep.subr.bf16.mxu1 %v1175_v37 }
  0x22   :  { %1011 = vmatmul.mubr.msk.bf16.vlgmr.msra.gmra.mrb[4].mxu0 %vm135_vm0, %v38_v14 }
  0x23   :  { %727 = vmatpush1.bf16.msra.mxu0 %v1159_v32 }
  0x24   :  { %728 = vmatprep.subr.bf16.mxu0 %v1167_v34  ;;  %700 = vmatpush1.bf16.msra.mxu1 %v1180_v40 }
  0x25   :  { %701 = vmatprep.subr.bf16.mxu1 %v1181_v42 }
  0x27   :  { %729 = vmatpush1.bf16.msra.mxu0 %v1165_v35 }
  0x28   :  { %730 = vmatprep.subr.bf16.mxu0 %v1173_v38  ;;  %702 = vmatpush1.bf16.msra.mxu1 %v1186_v43 }
  0x29   :  { %703 = vmatprep.subr.bf16.mxu1 %v1187_v45 }
  0x2b   :  { %731 = vmatpush1.bf16.msra.mxu0 %v1171_v39 }
  0x2c   :  { %732 = vmatprep.subr.bf16.mxu0 %v1179_v41  ;;  %704 = vmatpush1.bf16.msra.mxu1 %v1192_v47 }
  0x2d   :  { %705 = vmatprep.subr.bf16.mxu1 %v1193_v49 }
  0x2f   :  { %733 = vmatpush1.bf16.msra.mxu0 %v1177_v44 }
  0x30   :  { %734 = vmatprep.subr.bf16.mxu0 %v1185_v46  ;;  %706 = vmatpush1.bf16.msra.mxu1 %v1198_v51 }
  0x31   :  { %707 = vmatprep.subr.bf16.mxu1 %v1199_v53 }
  0x33   :  { %735 = vmatpush1.bf16.msra.mxu0 %v1183_v48 }
  0x34   :  { %736 = vmatprep.subr.bf16.mxu0 %v1191_v50 }
  0x37   :  { %737 = vmatpush1.bf16.msra.mxu0 %v1189_v52 }
  0x38   :  { %738 = vmatprep.subr.bf16.mxu0 %v1197_v54 }
  0x39   :  { %15 = vsyncpa [#allocation3], 0  ;;  %708 = vmatpush1.bf16.msra.mxu1 %v1204_v55  ;;  %v1210_v59 = vld [vmem:[%s1679_s4 + $0xc0] ss:$8 sps:$4 sm:$0xff]   ;;  %v1201_v60 = vld [vmem:[%s1679_s4 + $0x170] ss:$8 sps:$4 sm:$0xff]   ;;  %v223_v20 = vlaneseq }
  0x3a   :  { %709 = vmatprep.subr.bf16.mxu1 %v1205_v57  ;;  %v1209_v61 = vld [vmem:[%s1679_s4 + $0x184] ss:$8 sps:$4 sm:$0xff]   ;;  %v1207_v62 = vld [vmem:[%s1679_s4 + $0x180] ss:$8 sps:$4 sm:$0xff]   ;;  %v1211_v63 = vld [vmem:[%s1679_s4 + $0xd4] ss:$8 sps:$4 sm:$0xff]  }
  0x3b   :  { %739 = vmatpush1.bf16.msra.mxu0 %v1195_v56  ;;  %v1215_v0 = vld [vmem:[%s1679_s4 + $0x194] ss:$8 sps:$4 sm:$0xff]   ;;  %v1213_v1 = vld [vmem:[%s1679_s4 + $0x190] ss:$8 sps:$4 sm:$0xff]   ;;  %v1217_v3 = vld [vmem:[%s1679_s4 + $0xe4] ss:$8 sps:$4 sm:$0xff]  }
  0x3c   :  { %740 = vmatprep.subr.bf16.mxu0 %v1203_v58  ;;  %v1216_v2 = vld [vmem:[%s1679_s4 + $0xd0] ss:$8 sps:$4 sm:$0xff]   ;;  %v1221_v4 = vld [vmem:[%s1679_s4 + $0x1a4] ss:$8 sps:$4 sm:$0xff]   ;;  %v1219_v5 = vld [vmem:[%s1679_s4 + $0x1a0] ss:$8 sps:$4 sm:$0xff]  }
  0x3d   :  { %710 = vmatpush1.bf16.msra.mxu1 %v1210_v59  ;;  %v1222_v6 = vld [vmem:[%s1679_s4 + $0xe0] ss:$8 sps:$4 sm:$0xff]   ;;  %v1223_v7 = vld [vmem:[%s1679_s4 + $0xf4] ss:$8 sps:$4 sm:$0xff]   ;;  %v1225_v8 = vld [vmem:[%s1679_s4 + $0x1b0] ss:$8 sps:$4 sm:$0xff]  }
  0x3e   :  { %711 = vmatprep.subr.bf16.mxu1 %v1211_v63  ;;  %v1227_v9 = vld [vmem:[%s1679_s4 + $0x1b4] ss:$8 sps:$4 sm:$0xff]   ;;  %v1228_v10 = vld [vmem:[%s1679_s4 + $0xf0] ss:$8 sps:$4 sm:$0xff]   ;;  %v1231_v11 = vld [vmem:[%s1679_s4 + $0x1c4] ss:$8 sps:$4 sm:$0xff]  }
  0x3f   :  { %741 = vmatpush1.bf16.msra.mxu0 %v1201_v60  ;;  %v1229_v12 = vld [vmem:[%s1679_s4 + $0x1c0] ss:$8 sps:$4 sm:$0xff]   ;;  %v1234_v13 = vld [vmem:[%s1679_s4 + $0x1d4] ss:$8 sps:$4 sm:$0xff]   ;;  %v1232_v14 = vld [vmem:[%s1679_s4 + $0x1d0] ss:$8 sps:$4 sm:$0xff]  }
  0x40   :  { %742 = vmatprep.subr.bf16.mxu0 %v1209_v61  ;;  %v1237_v15 = vld [vmem:[%s1679_s4 + $0x1e4] ss:$8 sps:$4 sm:$0xff]   ;;  %v1235_v16 = vld [vmem:[%s1679_s4 + $0x1e0] ss:$8 sps:$4 sm:$0xff]   ;;  %v1240_v17 = vld [vmem:[%s1679_s4 + $0x1f4] ss:$8 sps:$4 sm:$0xff]  }
  0x41   :  { %712 = vmatpush1.bf16.msra.mxu1 %v1216_v2  ;;  %v1238_v18 = vld [vmem:[%s1679_s4 + $0x1f0] ss:$8 sps:$4 sm:$0xff]   ;;  %v1241_v19 = vld [vmem:[%s1683_s8 + $0x40] sm:$0xff]   ;;  %v224_v21 = vshrl.u32 %v223_v20, 7  ;;  %v1244_v2 = vld [vmem:[%s1683_s8 + $0x8] sm:$0xff]   ;;  %vm978_vm7 = vcmask 17408  }
  0x42   :  { %713 = vmatprep.subr.bf16.mxu1 %v1217_v3  ;;  %v221_v23 = vld [vmem:[%s1677_s2] sm:$0xf]  ;;  %v1245_v3 = vld [vmem:[%s1683_s8 + $0x50] sm:$0xff]  }
  0x43   :  { %743 = vmatpush1.bf16.msra.mxu0 %v1207_v62  ;;  %v1586_v22 = vsub.s32 0, %v224_v21  ;;  %v1591_v24 = vsub.s32 1, %v224_v21  ;;  %v247_v25 = vld [vmem:[%s1678_s3] sm:$0xf]  ;;  %v233_v43 = vsub.s32 2, %v224_v21  ;;  %v237_v46 = vsub.s32 3, %v224_v21 }
  0x44   :  { %744 = vmatprep.subr.bf16.mxu0 %v1215_v0  ;;  %v1242_v44 = vld [vmem:[%s1683_s8] sm:$0xff]  }
  0x45   :  { %714 = vmatpush1.bf16.msra.mxu1 %v1222_v6  ;;  %v226_v26 = vrot.slane %v221_v23, %v1586_v22  ;;  %v230_v27 = vrot.slane %v221_v23, %v1591_v24  ;;  %v252_v28 = vrot.slane %v247_v25, %v1586_v22  ;;  %v256_v30 = vrot.slane %v247_v25, %v1591_v24  ;;  %v1248_v6 = vld [vmem:[%s1683_s8 + $0x18] sm:$0xff]  }
  0x46   :  { %715 = vmatprep.subr.bf16.mxu1 %v1223_v7  ;;  %v234_v47 = vrot.slane %v221_v23, %v233_v43  ;;  %v238_v48 = vrot.slane %v221_v23, %v237_v46  ;;  %v260_v49 = vrot.slane %v247_v25, %v233_v43  ;;  %v264_v51 = vrot.slane %v247_v25, %v237_v46  ;;  %v1249_v7 = vld [vmem:[%s1683_s8 + $0x60] sm:$0xff]  }
  0x47   :  { %745 = vmatpush1.bf16.msra.mxu0 %v1213_v1  ;;  %v1243_v1 = vld [vmem:[%s1683_s8 + $0x48] sm:$0xff]   ;;  %v767_v23 = vld [vmem:[%s1681_s6] sm:$0x3] }
  0x48   :  { %746 = vmatprep.subr.bf16.mxu0 %v1221_v4  ;;  %v1246_v4 = vld [vmem:[%s1683_s8 + $0x10] sm:$0xff]   ;;  %v781_v25 = vld [vmem:[%s1682_s7] sm:$0x3]  ;;  %s1282_s7 = smov [#allocation2]  }
  0x49   :  { %716 = vmatpush1.bf16.msra.mxu1 %v1228_v10  ;;  %v1252_v10 = vld [vmem:[%s1683_s8 + $0x28] sm:$0xff]   ;;  %s986_s15 = sshll.u32 %s1282_s7, 4  ;;  %s987_s15 = int_to_ptr.vmem [resolvable:$true] %s986_s15 }
  0x4a   :  { %1093 = vmatprep.subr.bf16.mxu1 %v1241_v19  ;;  %v353_v19 = vld [vmem:[%s1680_s5] sm:$0x3]  ;;  %s1257_s16 = scalar_lea.vmem %s987_s15, 32  ;;  %p1262_p1 = scmp.lt.s32.totalorder %s987_s15, %s987_s15 }
  0x4b   :  { %747 = vmatpush1.bf16.msra.mxu0 %v1219_v5  ;;  %v1247_v5 = vld [vmem:[%s1683_s8 + $0x58] sm:$0xff]   ;;  %v358_v20 = vrot.slane %v353_v19, %v1586_v22  ;;  %v362_v21 = vrot.slane %v353_v19, %v1591_v24  ;;  %p1258_p0 = scmp.ne.s32.totalorder %s987_s15, %s1257_s16  ;;  %p1263_p2 = scmp.lt.s32.totalorder %s1257_s16, %s1257_s16 }
  0x4c   :  { %748 = vmatprep.subr.bf16.mxu0 %v1227_v9  ;;  %v1251_v9 = vld [vmem:[%s1683_s8 + $0x68] sm:$0xff]  }
  0x4d   :  { %p1264_p3 = por %p1263_p2, %p1262_p1 }
  0x4f   :  { %749 = vmatpush1.bf16.msra.mxu0 %v1225_v8  ;;  %v1250_v8 = vld [vmem:[%s1683_s8 + $0x20] sm:$0xff]   ;;  %p1265_p4 = pnand %p1264_p3, %p1258_p0 }
  0x50   :  { %750 = vmatprep.subr.bf16.mxu0 %v1231_v11  ;;  %v1253_v11 = vld [vmem:[%s1683_s8 + $0x70] sm:$0xff]  }
  0x53   :  { %751 = vmatpush1.bf16.msra.mxu0 %v1229_v12  ;;  %v1254_v12 = vld [vmem:[%s1683_s8 + $0x30] sm:$0xff]  }
  0x54   :  { %752 = vmatprep.subr.bf16.mxu0 %v1234_v13  ;;  %v1255_v13 = vld [vmem:[%s1683_s8 + $0x78] sm:$0xff]  }
  0x57   :  { %753 = vmatpush1.bf16.msra.mxu0 %v1232_v14  ;;  %v1256_v14 = vld [vmem:[%s1683_s8 + $0x38] sm:$0xff]  }
  0x58   :  { %754 = vmatprep.subr.bf16.mxu0 %v1237_v15 }
  0x5b   :  { %755 = vmatpush1.bf16.msra.mxu0 %v1235_v16 }
  0x5c   :  { %756 = vmatprep.subr.bf16.mxu0 %v1240_v17 }
  0x5f   :  { %757 = vmatpush1.bf16.msra.mxu0 %v1238_v18 }
  0xe5   :  { %v173_v29 = vpop.f32.mrb[0].mxu0 }
  0xe6   :  { %v243_v31 = vmul.f32 %v226_v26, %v173_v29  ;;  %v175_v32 = vpop.f32.mrb[1].mxu0 }
  0xe7   :  { %v244_v33 = vmul.f32 %v230_v27, %v175_v32  ;;  %v177_v34 = vpop.f32.mrb[2].mxu0  ;;  %v772_v27 = vrot.slane %v767_v23, %v1586_v22  ;;  %v786_v32 = vrot.slane %v781_v25, %v1586_v22 }
  0xe8   :  { %v269_v35 = vadd.f32 %v252_v28, %v243_v31  ;;  %v178_v36 = vpop.f32.mrb[3].mxu0 }
  0xe9   :  { %v270_v37 = vadd.f32 %v256_v30, %v244_v33  ;;  %v776_v30 = vrot.slane %v767_v23, %v1591_v24 }
  0xea   :  { %v277_v38 = vmul.f32 0.2, %v269_v35  ;;  %vm273_vm1 = vcmp.gt.f32.partialorder %v269_v35, 0.0 }
  0xeb   :  { %vm274_vm2 = vcmp.gt.f32.partialorder %v270_v37, 0.0  ;;  %v278_v39 = vmul.f32 0.2, %v270_v37 }
  0xec   :  { %v281_v40 = vsel %vm273_vm1, %v269_v35, %v277_v38  ;;  %v790_v35 = vrot.slane %v781_v25, %v1591_v24  ;;  %v1076_v24 = vld [vmem:[%s1684_s9] ss:$0 sm:$0xff] }
  0xed   :  { %v282_v41 = vsel %vm274_vm2, %v270_v37, %v278_v39  ;;  %v285_v45 = vpack.c.bf16 %v281_v40, %v281_v40 }
  0xee   :  { %v286_v42 = vpack.c.bf16 %v282_v41, %v282_v41 }
  0xf0   :  { %717 = vmatprep.mubr.bf16.mxu1 %v286_v42 }
  0xf1   :  { %718 = vmatmul.mubr.bf16.vlgmr.msra.gmra.mrb[0].mxu1 %v285_v45 }
  0xf2   :  { %1094 = vmatpush3.bf16.msra.mxu1 %v1242_v44 }
  0xf3   :  { %1095 = vmatprep.subr.bf16.mxu1 %v1243_v1 }
  0xf5   :  { %v214_v50 = vpop.f32.mrb[4].mxu0 }
  0xf6   :  { %v245_v52 = vmul.f32 %v234_v47, %v214_v50  ;;  %v216_v53 = vpop.f32.mrb[5].mxu0  ;;  %1096 = vmatpush3.bf16.msra.mxu1 %v1244_v2 }
  0xf7   :  { %v246_v54 = vmul.f32 %v238_v48, %v216_v53  ;;  %v218_v55 = vpop.f32.mrb[6].mxu0  ;;  %1097 = vmatprep.subr.bf16.mxu1 %v1245_v3 }
  0xf8   :  { %v271_v56 = vadd.f32 %v260_v49, %v245_v52  ;;  %v219_v57 = vpop.f32.mrb[7].mxu0 }
  0xf9   :  { %v272_v58 = vadd.f32 %v264_v51, %v246_v54 }
  0xfa   :  { %vm275_vm3 = vcmp.gt.f32.partialorder %v271_v56, 0.0  ;;  %v279_v59 = vmul.f32 0.2, %v271_v56  ;;  %1098 = vmatpush3.bf16.msra.mxu1 %v1246_v4 }
  0xfb   :  { %v280_v60 = vmul.f32 0.2, %v272_v58  ;;  %vm276_vm4 = vcmp.gt.f32.partialorder %v272_v58, 0.0  ;;  %1099 = vmatprep.subr.bf16.mxu1 %v1247_v5 }
  0xfc   :  { %v283_v61 = vsel %vm275_vm3, %v271_v56, %v279_v59 }
  0xfd   :  { %v284_v62 = vsel %vm276_vm4, %v272_v58, %v280_v60  ;;  %v287_v0 = vpack.c.bf16 %v283_v61, %v283_v61 }
  0xfe   :  { %v288_v63 = vpack.c.bf16 %v284_v62, %v284_v62  ;;  %1100 = vmatpush3.bf16.msra.mxu1 %v1248_v6 }
  0xff   :  { %1101 = vmatprep.subr.bf16.mxu1 %v1249_v7 }
 0x100   :  { %758 = vmatprep.mubr.bf16.mxu0 %v288_v63 }
 0x101   :  { %759 = vmatmul.mubr.bf16.vlgmr.msra.gmra.mrb[8].mxu0 %v287_v0 }
 0x102   :  { %1102 = vmatpush3.bf16.msra.mxu1 %v1250_v8 }
 0x103   :  { %1103 = vmatprep.subr.bf16.mxu1 %v1251_v9 }
 0x106   :  { %1104 = vmatpush3.bf16.msra.mxu1 %v1252_v10 }
 0x107   :  { %1105 = vmatprep.subr.bf16.mxu1 %v1253_v11 }
 0x10a   :  { %1106 = vmatpush3.bf16.msra.mxu1 %v1254_v12 }
 0x10b   :  { %1107 = vmatprep.subr.bf16.mxu1 %v1255_v13 }
 0x10e   :  { %1108 = vmatpush3.bf16.msra.mxu1 %v1256_v14 }
 0x1c4   :  { %v719_v15 = vpop.f32.mrb[0].mxu1 }
 0x1c5   :  { %v721_v16 = vpop.f32.mrb[1].mxu1  ;;  %v720_v26 = vadd.f32 %v719_v15, %v358_v20 }
 0x1c6   :  { %v723_v17 = vpop.f32.mrb[2].mxu1  ;;  %v722_v28 = vadd.f32 %v721_v16, %v362_v21 }
 0x1c7   :  { %v724_v18 = vpop.f32.mrb[3].mxu1 }
 0x1d4   :  { %v760_v29 = vpop.f32.mrb[8].mxu0 }
 0x1d5   :  { %v761_v31 = vadd.f32 %v760_v29, %v720_v26  ;;  %v762_v33 = vpop.f32.mrb[9].mxu0 }
 0x1d6   :  { %v763_v34 = vadd.f32 %v762_v33, %v722_v28  ;;  %v764_v36 = vpop.f32.mrb[10].mxu0 }
 0x1d7   :  { %v779_v37 = vmul.f32 %v772_v27, %v761_v31  ;;  %v765_v38 = vpop.f32.mrb[11].mxu0 }
 0x1d8   :  { %v780_v39 = vmul.f32 %v776_v30, %v763_v34 }
 0x1d9   :  { %v793_v40 = vadd.f32 %v786_v32, %v779_v37 }
 0x1da   :  { %v794_v41 = vadd.f32 %v790_v35, %v780_v39 }
 0x1db   :  { %vm795_vm5 = vcmp.gt.f32.partialorder %v793_v40, 0.0  ;;  %v797_v42 = vmul.f32 0.2, %v793_v40 }
 0x1dc   :  { %vm796_vm6 = vcmp.gt.f32.partialorder %v794_v41, 0.0  ;;  %v798_v43 = vmul.f32 0.2, %v794_v41 }
 0x1dd   :  { %v799_v44 = vsel %vm795_vm5, %v793_v40, %v797_v42 }
 0x1de   :  { %v800_v45 = vsel %vm796_vm6, %v794_v41, %v798_v43  ;;  %v801_v47 = vpack.c.bf16 %v799_v44, %v799_v44 }
 0x1df   :  { %v802_v46 = vpack.c.bf16 %v800_v45, %v800_v45 }
 0x1e1   :  { %970 = vmatprep.mubr.bf16.mxu1 %v802_v46 }
 0x1e2   :  { %971 = vmatmul.mubr.bf16.vlgmr.msra.gmra.mrb[4].mxu1 %v801_v47 }
 0x2b5   :  { %v1109_v22 = vpop.f32.mrb[4].mxu1 }
 0x2b6   :  { %v1110_v48 = vpop.f32.mrb[5].mxu1 }
 0x2b7   :  { %v1111_v49 = vadd.f32 %v1110_v48, %v1109_v22  ;;  %v1112_v50 = vpop.f32.mrb[6].mxu1 }
 0x2b8   :  { %v1113_v51 = vpop.f32.mrb[7].mxu1 }
 0x2b9   :  { %v973_v52 = vadd.f32 %v1111_v49, %v1076_v24 }
 0x2bb   :  { %979 = vst.msk [vmem:[#allocation2] sm:$0x3] %vm978_vm7, %v973_v52 }
 0x2bc   :  { %1268 = shalt.err (!%p1265_p4)
}
 0x2bd   :  { %s1269_s9 = scalar_lea.hbm %s1685_s10, 32 }
 0x2be   :  { %p1270_p5 = scmp.ne.s32.totalorder %s1685_s10, %s1269_s9  ;;  %p1273_p6 = scmp.lt.u32.totalorder %s1269_s9, %s1685_s10 }
 0x2c0   :  { %p1275_p7 = pnand %p1273_p6, %p1270_p5 }
 0x2c2   :  { %1278 = shalt.err (!%p1275_p7)
}
 0x2c3   :  { %989 = dma.vmem_to_hbm [thread:$0]  %s987_s15, 32, %s1685_s10, [#allocation3]  }
 0x2c4   :  { %1279 = dma.done.wait [#allocation3], 32  }
 0x2c5   :  { %1280 = vsyncadd [#allocation3], 4294967264 }
 0x2c6   :  { %993 = vsyncpa [#allocation3], 1 }

</bundles_post_ra>
